<compile_context>
chip_gen: v7x
topology: tpu7x:2x2x1
jax: 0.10.0
libtpu: 0.0.40
codegen_flags: <defaults>
</compile_context>

<pallas_src>
from functools import partial

import jax
import jax.numpy as jnp
from jax import lax
from jax.experimental import pallas as pl
from jax.experimental.pallas import tpu as pltpu

BN_EPS = 1e-5
LANE = 128


def _round_up(x, m):
    return ((x + m - 1) // m) * m


def _im2col(xp, H, W, Cin_p):
    """xp: (H+2, W+2, Cin_p) zero-padded tile -> (H*W, 9*Cin_p)."""
    cols = []
    for dh in range(3):
        for dw in range(3):
            cols.append(xp[dh:dh + H, dw:dw + W, :].reshape(H * W, Cin_p))
    return jnp.concatenate(cols, axis=-1)


def _phase1_kernel(xp_ref, wf_ref, stats_ref, *, H, W, Cin_p, C2):
    """Fused conv (both branches) + per-channel sum / sum-of-squares."""
    xp = xp_ref[0]                                          # (H+2, W+2, Cin_p)
    patches = _im2col(xp, H, W, Cin_p)                      # (H*W, 9*Cin_p)
    y = jnp.dot(patches, wf_ref[...],
                preferred_element_type=jnp.float32)         # (H*W, 2*Cout_p)
    s = jnp.sum(y, axis=0, keepdims=True)                   # (1, C2)
    ss = jnp.sum(y * y, axis=0, keepdims=True)              # (1, C2)
    stats_ref[...] = jnp.concatenate(
        [s, ss, jnp.zeros((6, C2), jnp.float32)], axis=0)[None]


def _phase2_kernel(xp_ref, wc_ref, c_ref, o_ref, *, H, W, Cin_p, Cout_p):
    """Recompute the scale-folded conv and add the fused affine offset."""
    xp = xp_ref[0]                                          # (H+2, W+2, Cin_p)
    patches = _im2col(xp, H, W, Cin_p)                      # (H*W, 9*Cin_p)
    y = jnp.dot(patches, wc_ref[...],
                preferred_element_type=jnp.float32)         # (H*W, Cout_p)
    o_ref[...] = (y + c_ref[...]).reshape(1, H, W, Cout_p)


def fuse_block(x_nchw, w1, w3, gamma1, beta1, gamma2, beta2,
               *, matmul_dtype=jnp.float32):
    """x_nchw: (N, Cin, H, W); w1: (Cout, Cin, 1, 1); w3: (Cout, Cin, 3, 3).

    matmul_dtype=jnp.bfloat16 is recommended for real sizes on v6e/v7x
    (accumulation stays f32); default f32 keeps the 1e-3 reference check tight.
    """
    N, Cin, H, W = x_nchw.shape
    Cout = w1.shape[0]
    Cin_p = _round_up(Cin, LANE)
    Cout_p = _round_up(Cout, LANE)
    C2 = 2 * Cout_p
    K = 9 * Cin_p
    itemsize = jnp.dtype(matmul_dtype).itemsize

    # Single wrapper materialization: transpose + halo pad + channel pad.
    x = jnp.transpose(x_nchw, (0, 2, 3, 1)).astype(jnp.float32)          # NHWC
    xp = jnp.pad(x, ((0, 0), (1, 1), (1, 1), (0, Cin_p - Cin)))
    xp_mm = xp.astype(matmul_dtype)

    # Fused weights (K, 2*Cout_p): cols [0:Cout_p]=3x3 branch, [Cout_p:]=1x1
    # branch placed at the centre tap (dh=dw=1 -> rows [4*Cin_p, 5*Cin_p)).
    w3_t = jnp.transpose(w3, (2, 3, 1, 0)).astype(jnp.float32)   # (3,3,Cin,Cout)
    w3_p = jnp.pad(w3_t, ((0, 0), (0, 0), (0, Cin_p - Cin), (0, Cout_p - Cout)))
    w3_mat = w3_p.reshape(K, Cout_p)
    w1_t = jnp.transpose(w1[:, :, 0, 0], (1, 0)).astype(jnp.float32)  # (Cin,Cout)
    w1_p = jnp.pad(w1_t, ((0, Cin_p - Cin), (0, Cout_p - Cout)))
    w1_mat = jnp.zeros((K, Cout_p), jnp.float32).at[
        4 * Cin_p:5 * Cin_p, :].set(w1_p)
    wf = jnp.concatenate([w3_mat, w1_mat], axis=1)               # (K, C2) f32

    g1p = jnp.pad(gamma1.astype(jnp.float32), (0, Cout_p - Cout))
    b1p = jnp.pad(beta1.astype(jnp.float32), (0, Cout_p - Cout))
    g2p = jnp.pad(gamma2.astype(jnp.float32), (0, Cout_p - Cout))
    b2p = jnp.pad(beta2.astype(jnp.float32), (0, Cout_p - Cout))

    compiler_params = pltpu.CompilerParams(
        dimension_semantics=("parallel",),       # batch shards across TCs (v7x)
        vmem_limit_bytes=64 * 1024 * 1024,       # explicit; within v7x's 64 MiB
    )

    # ---- Phase 1: fused conv + per-tile channel sum / sumsq -----------------
    xp_bytes = N * (H + 2) * (W + 2) * Cin_p * itemsize
    p1_cost = pl.CostEstimate(
        flops=2 * N * H * W * K * C2,
        transcendentals=0,
        bytes_accessed=xp_bytes + K * C2 * itemsize + N * 8 * C2 * 4)
    stats = pl.pallas_call(
        partial(_phase1_kernel, H=H, W=W, Cin_p=Cin_p, C2=C2),
        grid=(N,),
        in_specs=[
            pl.BlockSpec((1, H + 2, W + 2, Cin_p), lambda n: (n, 0, 0, 0)),
            pl.BlockSpec((K, C2), lambda n: (0, 0)),
        ],
        out_specs=pl.BlockSpec((1, 8, C2), lambda n: (n, 0, 0)),
        out_shape=jax.ShapeDtypeStruct((N, 8, C2), jnp.float32),
        compiler_params=compiler_params,
        cost_estimate=p1_cost,
    )(xp_mm, wf.astype(matmul_dtype))

    # ---- Tiny glue: global BN stats, fuse both BNs + add into one affine ----
    cnt = N * H * W
    mean = jnp.sum(stats[:, 0, :], axis=0) / cnt                     # (C2,)
    var = jnp.maximum(jnp.sum(stats[:, 1, :], axis=0) / cnt - mean * mean, 0.0)
    mean3, mean1 = mean[:Cout_p], mean[Cout_p:]
    var3, var1 = var[:Cout_p], var[Cout_p:]
    a3 = g2p * lax.rsqrt(var3 + BN_EPS)          # branch2 (3x3) BN scale
    a1 = g1p * lax.rsqrt(var1 + BN_EPS)          # branch1 (1x1) BN scale
    c = (b1p + b2p - a1 * mean1 - a3 * mean3).reshape(1, Cout_p)
    w_comb = (wf[:, :Cout_p] * a3[None, :]
              + wf[:, Cout_p:] * a1[None, :]).astype(matmul_dtype)   # (K,Cout_p)

    # ---- Phase 2: recompute scale-folded conv, add fused offset -------------
    p2_cost = pl.CostEstimate(
        flops=2 * N * H * W * K * Cout_p,
        transcendentals=0,
        bytes_accessed=xp_bytes + K * Cout_p * itemsize
        + N * H * W * Cout_p * 4)
    out_nhwc = pl.pallas_call(
        partial(_phase2_kernel, H=H, W=W, Cin_p=Cin_p, Cout_p=Cout_p),
        grid=(N,),
        in_specs=[
            pl.BlockSpec((1, H + 2, W + 2, Cin_p), lambda n: (n, 0, 0, 0)),
            pl.BlockSpec((K, Cout_p), lambda n: (0, 0)),
            pl.BlockSpec((1, Cout_p), lambda n: (0, 0)),
        ],
        out_specs=pl.BlockSpec((1, H, W, Cout_p), lambda n: (n, 0, 0, 0)),
        out_shape=jax.ShapeDtypeStruct((N, H, W, Cout_p), jnp.float32),
        compiler_params=compiler_params,
        cost_estimate=p2_cost,
    )(xp_mm, w_comb, c)

    # Drop channel padding, back to NCHW.
    return jnp.transpose(out_nhwc[..., :Cout], (0, 3, 1, 2))


def fuse_block_ref(x, w1, w3, g1, b1, g2, b2):
    """Pure-JAX reference (NCHW, training-mode BN with batch statistics)."""
    dn = lax.conv_dimension_numbers(x.shape, w1.shape, ('NCHW', 'OIHW', 'NCHW'))
    c1 = lax.conv_general_dilated(x, w1, (1, 1), 'VALID', dimension_numbers=dn)
    c3 = lax.conv_general_dilated(x, w3, (1, 1), ((1, 1), (1, 1)),
                                  dimension_numbers=dn)

    def bn(y, g, b):
        mean = jnp.mean(y, axis=(0, 2, 3), keepdims=True)
        var = jnp.mean((y - mean) ** 2, axis=(0, 2, 3), keepdims=True)
        return (g.reshape(1, -1, 1, 1) * (y - mean) * lax.rsqrt(var + BN_EPS)
                + b.reshape(1, -1, 1, 1))

    return bn(c1, g1, b1) + bn(c3, g2, b2)


if __name__ == "__main__":
    N, Cin, Cout, H, W = 2, 4, 8, 16, 16

    key = jax.random.PRNGKey(0)
    k_x, k_w1, k_w3, k_g1, k_b1, k_g2, k_b2 = jax.random.split(key, 7)

    x = jax.random.normal(k_x, (N, Cin, H, W), dtype=jnp.float32)
    w1 = 0.1 * jax.random.normal(k_w1, (Cout, Cin, 1, 1), dtype=jnp.float32)
    w3 = 0.1 * jax.random.normal(k_w3, (Cout, Cin, 3, 3), dtype=jnp.float32)
    gamma1 = 1.0 + 0.1 * jax.random.normal(k_g1, (Cout,), dtype=jnp.float32)
    beta1 = 0.1 * jax.random.normal(k_b1, (Cout,), dtype=jnp.float32)
    gamma2 = 1.0 + 0.1 * jax.random.normal(k_g2, (Cout,), dtype=jnp.float32)
    beta2 = 0.1 * jax.random.normal(k_b2, (Cout,), dtype=jnp.float32)

    out = jax.block_until_ready(
        fuse_block(x, w1, w3, gamma1, beta1, gamma2, beta2))
    ref = jax.block_until_ready(
        fuse_block_ref(x, w1, w3, gamma1, beta1, gamma2, beta2))

    assert out.shape == (N, Cout, H, W), out.shape
    assert jnp.allclose(out, ref, rtol=1e-3, atol=1e-3), \
        float(jnp.max(jnp.abs(out - ref)))
    print("KERNEL_OK")
</pallas_src>

<mosaic_0001>
module attributes {stable_mosaic.version = 11 : i64} {
  func.func @_phase1_kernel(%arg0: i32, %arg1: memref<1x18x18x128xf32, #tpu.memory_space<vmem>>, %arg2: memref<1152x256xf32, #tpu.memory_space<vmem>>, %arg3: memref<1x8x256xf32, #tpu.memory_space<vmem>>) attributes {dimension_semantics = [#tpu.dimension_semantics<parallel>], iteration_bounds = array<i64: 2>, scalar_prefetch = 0 : i64, scratch_operands = 0 : i64, tpu.core_type = #tpu.core_type<tc>, window_params = [{transform_indices = @transform_0, window_bounds = array<i64: 1, 18, 18, 128>}, {pipeline_mode = #tpu.pipeline_mode<synchronous>, transform_indices = @transform_1, window_bounds = array<i64: 1152, 256>}, {transform_indices = @transform_2, window_bounds = array<i64: 1, 8, 256>}]} {
    %c0 = arith.constant 0 : index
    %c0_0 = arith.constant 0 : index
    %c0_1 = arith.constant 0 : index
    %c0_2 = arith.constant 0 : index
    %0 = vector.load %arg1[%c0, %c0_0, %c0_1, %c0_2] : memref<1x18x18x128xf32, #tpu.memory_space<vmem>>, vector<1x18x18x128xf32>
    %1 = vector.shape_cast %0 : vector<1x18x18x128xf32> to vector<18x18x128xf32>
    %2 = vector.extract_strided_slice %1 {offsets = [0, 0, 0], sizes = [16, 16, 128], strides = [1, 1, 1]} : vector<18x18x128xf32> to vector<16x16x128xf32>
    %3 = vector.shape_cast %2 : vector<16x16x128xf32> to vector<256x128xf32>
    %4 = vector.extract_strided_slice %1 {offsets = [0, 1, 0], sizes = [16, 16, 128], strides = [1, 1, 1]} : vector<18x18x128xf32> to vector<16x16x128xf32>
    %5 = vector.shape_cast %4 : vector<16x16x128xf32> to vector<256x128xf32>
    %6 = vector.extract_strided_slice %1 {offsets = [0, 2, 0], sizes = [16, 16, 128], strides = [1, 1, 1]} : vector<18x18x128xf32> to vector<16x16x128xf32>
    %7 = vector.shape_cast %6 : vector<16x16x128xf32> to vector<256x128xf32>
    %8 = vector.extract_strided_slice %1 {offsets = [1, 0, 0], sizes = [16, 16, 128], strides = [1, 1, 1]} : vector<18x18x128xf32> to vector<16x16x128xf32>
    %9 = vector.shape_cast %8 : vector<16x16x128xf32> to vector<256x128xf32>
    %10 = vector.extract_strided_slice %1 {offsets = [1, 1, 0], sizes = [16, 16, 128], strides = [1, 1, 1]} : vector<18x18x128xf32> to vector<16x16x128xf32>
    %11 = vector.shape_cast %10 : vector<16x16x128xf32> to vector<256x128xf32>
    %12 = vector.extract_strided_slice %1 {offsets = [1, 2, 0], sizes = [16, 16, 128], strides = [1, 1, 1]} : vector<18x18x128xf32> to vector<16x16x128xf32>
    %13 = vector.shape_cast %12 : vector<16x16x128xf32> to vector<256x128xf32>
    %14 = vector.extract_strided_slice %1 {offsets = [2, 0, 0], sizes = [16, 16, 128], strides = [1, 1, 1]} : vector<18x18x128xf32> to vector<16x16x128xf32>
    %15 = vector.shape_cast %14 : vector<16x16x128xf32> to vector<256x128xf32>
    %16 = vector.extract_strided_slice %1 {offsets = [2, 1, 0], sizes = [16, 16, 128], strides = [1, 1, 1]} : vector<18x18x128xf32> to vector<16x16x128xf32>
    %17 = vector.shape_cast %16 : vector<16x16x128xf32> to vector<256x128xf32>
    %18 = vector.extract_strided_slice %1 {offsets = [2, 2, 0], sizes = [16, 16, 128], strides = [1, 1, 1]} : vector<18x18x128xf32> to vector<16x16x128xf32>
    %19 = vector.shape_cast %18 : vector<16x16x128xf32> to vector<256x128xf32>
    %20 = tpu.concatenate %3, %5, %7, %9, %11, %13, %15, %17, %19 in 1 : vector<256x128xf32>, vector<256x128xf32>, vector<256x128xf32>, vector<256x128xf32>, vector<256x128xf32>, vector<256x128xf32>, vector<256x128xf32>, vector<256x128xf32>, vector<256x128xf32> -> vector<256x1152xf32>
    %c0_3 = arith.constant 0 : index
    %c0_4 = arith.constant 0 : index
    %21 = vector.load %arg2[%c0_3, %c0_4] : memref<1152x256xf32, #tpu.memory_space<vmem>>, vector<1152x256xf32>
    %cst = arith.constant dense<0.000000e+00> : vector<256x256xf32>
    %22 = tpu.matmul %20, %21, %cst {dimension_numbers = #tpu.dot_dimension_numbers<[1], [0], [0], [1], [0, 0, 1, 1], [], []>} : vector<256x1152xf32>, vector<1152x256xf32>, vector<256x256xf32> -> vector<256x256xf32>
    %cst_5 = arith.constant dense<0.000000e+00> : vector<256xf32>
    %23 = vector.multi_reduction <add>, %22, %cst_5 [0] : vector<256x256xf32> to vector<256xf32>
    %24 = vector.shape_cast %23 : vector<256xf32> to vector<1x256xf32>
    %25 = arith.mulf %22, %22 : vector<256x256xf32>
    %cst_6 = arith.constant dense<0.000000e+00> : vector<256xf32>
    %26 = vector.multi_reduction <add>, %25, %cst_6 [0] : vector<256x256xf32> to vector<256xf32>
    %27 = vector.shape_cast %26 : vector<256xf32> to vector<1x256xf32>
    %cst_7 = arith.constant 0.000000e+00 : f32
    %28 = vector.broadcast %cst_7 : f32 to vector<6x256xf32>
    %29 = tpu.concatenate %24, %27, %28 in 0 : vector<1x256xf32>, vector<1x256xf32>, vector<6x256xf32> -> vector<8x256xf32>
    %30 = vector.shape_cast %29 : vector<8x256xf32> to vector<1x8x256xf32>
    %c0_8 = arith.constant 0 : index
    %c0_9 = arith.constant 0 : index
    %c0_10 = arith.constant 0 : index
    %31 = vector.load %arg3[%c0_8, %c0_9, %c0_10] : memref<1x8x256xf32, #tpu.memory_space<vmem>>, vector<1x8x256xf32>
    tpu.vector_store %arg3[%c0_8, %c0_9, %c0_10], %30 {strides = array<i32>} : memref<1x8x256xf32, #tpu.memory_space<vmem>>, vector<1x8x256xf32>,
    return
  }
  func.func @transform_0(%arg0: i32) -> (i32, i32, i32, i32) {
    %c0_i32 = arith.constant 0 : i32
    %c0_i32_0 = arith.constant 0 : i32
    %c0_i32_1 = arith.constant 0 : i32
    %c0_i32_2 = arith.constant 0 : i32
    return %arg0, %c0_i32, %c0_i32_0, %c0_i32_1 : i32, i32, i32, i32
  }
  func.func @transform_1(%arg0: i32) -> (i32, i32) {
    %c0_i32 = arith.constant 0 : i32
    %c0_i32_0 = arith.constant 0 : i32
    %c0_i32_1 = arith.constant 0 : i32
    return %c0_i32, %c0_i32_0 : i32, i32
  }
  func.func @transform_2(%arg0: i32) -> (i32, i32, i32) {
    %c0_i32 = arith.constant 0 : i32
    %c0_i32_0 = arith.constant 0 : i32
    %c0_i32_1 = arith.constant 0 : i32
    return %arg0, %c0_i32, %c0_i32_0 : i32, i32, i32
  }
}

</mosaic_0001>

<bundles_post_ra>
// kernel: tpu_custom_call.1
= control target key start
LH: loop header
LB: loop body
LE: loop exit
PB: predicated region body
PF: predicated region fallthrough
CT: control target
= control target key end

     0   :  { %7 = vsyncpa [#allocation3], 0  ;;  %s4395_s0 = inlined_call_operand.hbm [shape: f32[2,18,18,128], index: 0, kind: input, shape index: {}]   ;;  %s4396_s1 = inlined_call_operand.hbm [shape: f32[1152,256], index: 1, kind: input, shape index: {}]   ;;  %s4397_s2 = inlined_call_operand.hbm [shape: f32[2,8,256], index: 2, kind: output, shape index: {}]  }
   0x1   :  { %9 = vsyncpa [#allocation3 + $0x1], 0 }
   0x2   :  { %10 = vsyncpa [#allocation6], 0 }
   0x3   :  { %11 = vsyncpa [#allocation4], 0 }
   0x4   :  { %13 = vsyncpa [#allocation4 + $0x1], 0  ;;  %s3243_s9 = smov 0   ;;  %s3245_s10 = smov 0  }
   0x5   :  { %s3247_s11 = smov 0   ;;  %s3249_s12 = smov 0  }
   0x6 LB: > { %s3264_s13 = sadd.s32 4294967295, %s3218_s12   ;;  %s2427_s14 = sadd.s32 4294967294, %s3218_s12   ;;  %s3218_s12 = sphi %s3249_s12, %s4554_s12   ;;  %s3214_s11 = sphi %s3247_s11, %s4553_s11   ;;  %s3210_s10 = sphi %s3245_s10, %s4552_s10   ;;  %s3206_s9 = sphi %s3243_s9, %s4551_s9  }
   0x7   : > { %p39_p0 = scmp.ne.s32.totalorder %s3210_s10, %s3206_s9  ;;  %p4398_p1 = scmp.eq.s32.totalorder %s3264_s13, 0 }
   0x8   : > { %p90_p3 = scmp.eq.s32.totalorder %s2427_s14, 1  ;;  %p2428_p5 = scmp.ge.s32.totalorder %s3218_s12, 1 }
   0x9   : > { %p3273_p4 = por %p4398_p1, %p39_p0  ;;  %p97_p7 = scmp.lt.s32.totalorder %s3218_s12, 3 }
   0xa   : > { %p3278_p6 = por %p90_p3, %p39_p0  ;;  %s3220_s18 = smov [#allocation5]  }
   0xb   : > { %s4455_s15 = scalar_select %p3273_p4, 1, 0 }
   0xc   : > { %s4456_s16 = scalar_select %p3278_p6, 1, 0 }
   0xd   : > { %p3283_p8 = pnand %p2428_p5, %p97_p7  ;;  %s109_s19 = sshll.u32 %s3220_s18, 4  ;;  %s3287_s19 = int_to_ptr.vmem [resolvable:$true] %s109_s19 }
   0xe   : > { %s3299_s21 = sadd.s32 1, %s3218_s12   ;;  %s26_s22 = sadd.s32 1, %s3214_s11 }
   0xf   : > { %s4457_s17 = scalar_select %p3283_p8, 1, 0 }
  0x10   : > { %p3028_p9 = pneg %p3283_p8  ;;  %s23_s23 = ssub.s32 %s3218_s12, %s3299_s21 }
  0x11   : > { %s3090_s26 = scalar_lea.hbm %s4396_s1, 36864 }
  0x12   : > { %p3294_p11 = pnand %p3028_p9, %p4398_p1  ;;  %p3091_p12 = scmp.ne.s32.totalorder %s4396_s1, %s3090_s26 }
  0x13   : > { %p3097_p5 = scmp.lt.u32.totalorder %s3090_s26, %s4396_s1 }
  0x14   : > { %p3092_p13 = pneg %p3294_p11 }
  0x16   : > { %p3093_p0 = pnand %p3092_p13, %p3091_p12 }
  0x18   : > { %p3094_p3 = pneg %p3093_p0 }
  0x1a   : > { %p3099_p7 = pnand %p3097_p5, %p3094_p3 }
  0x1c   : > { %3102 = shalt.err (!%p3099_p7)
}
  0x1d   : > { %s3103_s3 = scalar_lea.vmem %s3287_s19, 36864  ;;  %p3111_p2 = scmp.lt.s32.totalorder %s3287_s19, %s3287_s19 }
  0x1e   : > { %p3104_p9 = scmp.ne.s32.totalorder %s3287_s19, %s3103_s3  ;;  %p3112_p6 = scmp.lt.s32.totalorder %s3103_s3, %s3103_s3 }
  0x20   : > { %p3106_p10 = pnand %p3104_p9, %p3092_p13  ;;  %p3113_p4 = por %p3112_p6, %p3111_p2 }
  0x22   : > { %p3107_p1 = pneg %p3106_p10 }
  0x24   : > { %p3114_p8 = pnand %p3113_p4, %p3107_p1 }
  0x26   : > { %3117 = shalt.err (!%p3114_p8)
}
  0x27   : > { %s3221_s4 = smov 256   ;;  %s3222_s5 = smov 16  }
  0x28   : > { %3031 = dma.hbm_to_vmem [thread:$0]  (!%p3294_p11), %s4396_s1, 36864, %s3287_s19, [#allocation6], %s3221_s4, %s3221_s4, %s3222_s5  }
  0x29   : > { %p24_p2 = scmp.eq.s32.totalorder %s23_s23, 0  ;;  %p33_p1 = scmp.ne.s32.totalorder %s3214_s11, %s3210_s10 }
  0x2a   : > { %p34_p4 = scmp.eq.s32.totalorder %s3218_s12, 0  ;;  %p3041_p6 = scmp.lt.s32.totalorder %s3218_s12, 2 }
  0x2b   : > { %s3330_s8 = scalar_select %p24_p2, %s3214_s11, %s26_s22  }
  0x2c   : > { %p35_p8 = por %p34_p4, %p33_p1  ;;  %p4459_p10 = scmp.eq.s32.totalorder %s3264_s13, 1 }
  0x2d   : > { %s123_s18 = sand.u32 1, %s3214_s11   ;;  %s3018_s24 = smul.u32 6912, %s3218_s12 }
  0x2e   : > { %p3334_p12 = por %p4459_p10, %p33_p1  ;;  %s3017_s25 = smul.u32 432, %s123_s18 }
  0x2f   : > { %s3343_s27 = scalar_lea.hbm %s4395_s0, %s3018_s24  ;;  %p3345_p11 = pnand %p3041_p6, %p35_p8 }
  0x30   : > { %s127_s22 = scalar_lea.vmem [#allocation2], %s3017_s25  ;;  %s3351_s28 = scalar_lea.sflag [#allocation3], %s123_s18 }
  0x31   : > { %s134_s23 = sshll.u32 %s127_s22, 4  ;;  %s3118_s29 = scalar_lea.hbm %s3343_s27, 6912  ;;  %s3349_s23 = int_to_ptr.vmem [resolvable:$true] %s134_s23 }
  0x32   : > { %p3119_p13 = scmp.ne.s32.totalorder %s3343_s27, %s3118_s29  ;;  %p3120_p0 = pneg %p3345_p11 }
  0x33   : > { %s3123_s4 = scalar_lea.hbm %s4395_s0, 13824  ;;  %p3124_p7 = scmp.lt.u32.totalorder %s3343_s27, %s4395_s0 }
  0x34   : > { %p3121_p3 = pnand %p3120_p0, %p3119_p13  ;;  %p3125_p9 = scmp.lt.u32.totalorder %s3123_s4, %s3118_s29 }
  0x35   : > { %p3127_p1 = scmp.lt.u32.totalorder %s3118_s29, %s3343_s27 }
  0x36   : > { %p3122_p5 = pneg %p3121_p3  ;;  %p3126_p2 = por %p3125_p9, %p3124_p7 }
  0x38   : > { %p3128_p4 = por %p3127_p1, %p3126_p2 }
  0x3a   : > { %p3129_p6 = pnand %p3128_p4, %p3122_p5 }
  0x3c   : > { %3132 = shalt.err (!%p3129_p6)
}
  0x3d   : > { %s3133_s7 = scalar_lea.vmem %s3349_s23, 6912  ;;  %s3223_s18 = smov [#allocation2]  }
  0x3e   : > { %p3134_p8 = scmp.ne.s32.totalorder %s3349_s23, %s3133_s7  ;;  %s3138_s24 = sshll.u32 %s3223_s18, 4  ;;  %s3139_s24 = int_to_ptr.vmem [resolvable:$false] %s3138_s24 }
  0x3f   : > { %s3140_s25 = scalar_lea.vmem %s3139_s24, 13824  ;;  %p3141_p3 = scmp.lt.s32.totalorder %s3349_s23, %s3139_s24 }
  0x40   : > { %p3136_p10 = pnand %p3134_p8, %p3120_p0  ;;  %p3142_p7 = scmp.lt.s32.totalorder %s3140_s25, %s3133_s7 }
  0x42   : > { %p3137_p13 = pneg %p3136_p10  ;;  %p3143_p9 = por %p3142_p7, %p3141_p3 }
  0x44   : > { %p3144_p2 = pnand %p3143_p9, %p3137_p13 }
  0x46   : > { %3147 = shalt.err (!%p3144_p2)
}
  0x47   : > { %s3224_s20 = smov 128   ;;  %s3225_s26 = smov 8  }
  0x48   : > { %3035 = dma.hbm_to_vmem [thread:$0]  (!%p3345_p11), %s3343_s27, 6912, %s3349_s23, %s3351_s28, %s3224_s20, %s3224_s20, %s3225_s26  }
  0x49   : > { %p4462_p0 = scmp.ne.s32.totalorder %s4457_s17, 0 }
  0x4b   : > { %146 = sbr.rel (%p4462_p0) target bundleno = 722 (0x2d2), region = 28 }
  0x52   : > { %s3382_s22 = sand.u32 1, %s3210_s10   ;;  %p4463_p5 = scmp.ne.s32.totalorder %s4455_s15, 0 }
  0x53   : > { %s3019_s29 = smul.u32 432, %s3382_s22  ;;  %s149_s30 = scalar_lea.sflag [#allocation3], %s3382_s22 }
  0x55   : > { %s3386_s3 = scalar_lea.vmem [#allocation2], %s3019_s29 }
  0x56   : > { %3193 = dma.done.wait (%p4463_p5), %s149_s30, 6912  }
  0x57   : > { %3195 = vsyncadd (%p4463_p5), %s149_s30, 4294960384  ;;  %p4464_p11 = scmp.eq.s32.totalorder %s3264_s13, 0 }
  0x59   : > { %3197 = dma.done.wait (%p4464_p11), [#allocation6], 36864   ;;  %p4465_p1 = pmov %p4464_p11 }
  0x5a   : > { %v540_v0 = vld [vmem:[#allocation5 + $0x8] sm:$0xff]  ;;  %v542_v1 = vld [vmem:[#allocation5 + $0x18] sm:$0xff]  ;;  %v539_v5 = vld [vmem:[#allocation5] sm:$0xff]  ;;  %vm279_vm0 = vcmask 1046528   ;;  %vm392_vm1 = vcmask 1045504   ;;  %s2434_s15 = sshll.u32 %s3382_s22, 4 }
  0x5b   : > { %3199 = vsyncadd (%p4465_p1), [#allocation6], 4294930432  ;;  %v668_v2 = vld [vmem:[#allocation5 + $0x408] sm:$0xff]  ;;  %v2441_v3 = vpack.c.bf16 %v542_v1, %v540_v0  ;;  %v670_v4 = vld [vmem:[#allocation5 + $0x418] sm:$0xff]  ;;  %vm2324_vm2 = vcmask 1040384   ;;  %vm2327_vm3 = vcmask 1041408  }
  0x5c   : > { %v541_v6 = vld [vmem:[#allocation5 + $0x10] sm:$0xff]  ;;  %v3396_v7 = vpack.c.bf16 %v670_v4, %v668_v2  ;;  %v667_v9 = vld [vmem:[#allocation5 + $0x400] sm:$0xff]  ;;  %v544_v11 = vld [vmem:[#allocation5 + $0x28] sm:$0xff]  ;;  %s2440_s17 = sshll.u32 %s3264_s13, 8  ;;  %s176_s27 = scalar_lea.vmem [#allocation7], %s2434_s15 }
  0x5d   : > { %v2443_v8 = vpack.c.bf16 %v541_v6, %v539_v5  ;;  %v669_v10 = vld [vmem:[#allocation5 + $0x410] sm:$0xff]  ;;  %2442 = vmatprep.subr.bf16.mxu1 %v2441_v3  ;;  %v546_v13 = vld [vmem:[#allocation5 + $0x38] sm:$0xff]  ;;  %v672_v14 = vld [vmem:[#allocation5 + $0x428] sm:$0xff]  ;;  %s2347_s19 = sshll.u32 %s176_s27, 4  ;;  %s4351_s4 = scalar_lea.hbm %s4397_s2, %s2440_s17  ;;  %s4353_s19 = int_to_ptr.vmem [resolvable:$true] %s2347_s19 }
  0x5e   : > { %v3398_v12 = vpack.c.bf16 %v669_v10, %v667_v9  ;;  %v674_v15 = vld [vmem:[#allocation5 + $0x438] sm:$0xff]  ;;  %2570 = vmatprep.subr.bf16.mxu0 %v3396_v7  ;;  %v2445_v16 = vpack.c.bf16 %v546_v13, %v544_v11  ;;  %v543_v18 = vld [vmem:[#allocation5 + $0x20] sm:$0xff]  ;;  %v545_v19 = vld [vmem:[#allocation5 + $0x30] sm:$0xff]  ;;  %s2333_s13 = scalar_lea.sflag [#allocation4], %s3382_s22  ;;  %s3148_s5 = scalar_lea.vmem %s4353_s19, 256 }
  0x5f   : > { %2444 = vmatpush1.bf16.msra.mxu1 %v2443_v8  ;;  %v3401_v17 = vpack.c.bf16 %v674_v15, %v672_v14  ;;  %v671_v20 = vld [vmem:[#allocation5 + $0x420] sm:$0xff]  ;;  %v2447_v21 = vpack.c.bf16 %v545_v19, %v543_v18  ;;  %v673_v22 = vld [vmem:[#allocation5 + $0x430] sm:$0xff]  ;;  %v548_v23 = vld [vmem:[#allocation5 + $0x48] sm:$0xff]  ;;  %p3149_p4 = scmp.ne.s32.totalorder %s4353_s19, %s3148_s5  ;;  %s3227_s6 = smov [#allocation7]  }
  0x60   : > { %2572 = vmatpush1.bf16.msra.mxu0 %v3398_v12  ;;  %v550_v24 = vld [vmem:[#allocation5 + $0x58] sm:$0xff]  ;;  %2446 = vmatprep.subr.bf16.mxu1 %v2445_v16  ;;  %v3405_v25 = vpack.c.bf16 %v673_v22, %v671_v20  ;;  %v676_v27 = vld [vmem:[#allocation5 + $0x448] sm:$0xff]  ;;  %v547_v29 = vld [vmem:[#allocation5 + $0x40] sm:$0xff]  ;;  %s3152_s7 = sshll.u32 %s3227_s6, 4  ;;  %s3153_s7 = int_to_ptr.vmem [resolvable:$false] %s3152_s7 }
  0x61   : > { %2574 = vmatprep.subr.bf16.mxu0 %v3401_v17  ;;  %v2449_v26 = vpack.c.bf16 %v550_v24, %v548_v23  ;;  %v678_v28 = vld [vmem:[#allocation5 + $0x458] sm:$0xff]  ;;  %v549_v31 = vld [vmem:[#allocation5 + $0x50] sm:$0xff]  ;;  %v675_v32 = vld [vmem:[#allocation5 + $0x440] sm:$0xff]  ;;  %p3150_p6 = pnand %p3149_p4, %p3334_p12  ;;  %s3154_s18 = scalar_lea.vmem %s3153_s7, 512 }
  0x62   : > { %v3407_v30 = vpack.c.bf16 %v678_v28, %v676_v27  ;;  %v677_v33 = vld [vmem:[#allocation5 + $0x450] sm:$0xff]  ;;  %v2451_v34 = vpack.c.bf16 %v549_v31, %v547_v29  ;;  %v552_v35 = vld [vmem:[#allocation5 + $0x68] sm:$0xff]  ;;  %v554_v36 = vld [vmem:[#allocation5 + $0x78] sm:$0xff]  ;;  %p3155_p10 = scmp.lt.s32.totalorder %s4353_s19, %s3153_s7  ;;  %p3156_p13 = scmp.lt.s32.totalorder %s3154_s18, %s3148_s5 }
  0x63   : > { %2448 = vmatpush1.bf16.msra.mxu1 %v2447_v21  ;;  %v680_v37 = vld [vmem:[#allocation5 + $0x468] sm:$0xff]  ;;  %v3410_v38 = vpack.c.bf16 %v677_v33, %v675_v32  ;;  %v2453_v39 = vpack.c.bf16 %v554_v36, %v552_v35  ;;  %v682_v40 = vld [vmem:[#allocation5 + $0x478] sm:$0xff]  ;;  %v551_v41 = vld [vmem:[#allocation5 + $0x60] sm:$0xff]  ;;  %p3151_p8 = pneg %p3150_p6 }
  0x64   : > { %2576 = vmatpush1.bf16.msra.mxu0 %v3405_v25  ;;  %2450 = vmatprep.subr.bf16.mxu1 %v2449_v26  ;;  %v553_v42 = vld [vmem:[#allocation5 + $0x70] sm:$0xff]  ;;  %v3413_v43 = vpack.c.bf16 %v682_v40, %v680_v37  ;;  %v679_v44 = vld [vmem:[#allocation5 + $0x460] sm:$0xff]  ;;  %v556_v46 = vld [vmem:[#allocation5 + $0x88] sm:$0xff]  ;;  %p3157_p3 = por %p3156_p13, %p3155_p10 }
  0x65   : > { %2578 = vmatprep.subr.bf16.mxu0 %v3407_v30  ;;  %v681_v45 = vld [vmem:[#allocation5 + $0x470] sm:$0xff]  ;;  %v558_v47 = vld [vmem:[#allocation5 + $0x98] sm:$0xff]  ;;  %v684_v48 = vld [vmem:[#allocation5 + $0x488] sm:$0xff]  ;;  %v2455_v50 = vpack.c.bf16 %v553_v42, %v551_v41 }
  0x66   : > { %v686_v49 = vld [vmem:[#allocation5 + $0x498] sm:$0xff]  ;;  %v3416_v51 = vpack.c.bf16 %v681_v45, %v679_v44  ;;  %v2457_v52 = vpack.c.bf16 %v558_v47, %v556_v46  ;;  %v555_v53 = vld [vmem:[#allocation5 + $0x80] sm:$0xff]  ;;  %v557_v54 = vld [vmem:[#allocation5 + $0x90] sm:$0xff]  ;;  %p3158_p7 = pnand %p3157_p3, %p3151_p8 }
  0x67   : > { %2452 = vmatpush1.bf16.msra.mxu1 %v2451_v34  ;;  %v683_v55 = vld [vmem:[#allocation5 + $0x480] sm:$0xff]  ;;  %v3419_v56 = vpack.c.bf16 %v686_v49, %v684_v48  ;;  %v685_v57 = vld [vmem:[#allocation5 + $0x490] sm:$0xff]  ;;  %v560_v58 = vld [vmem:[#allocation5 + $0xa8] sm:$0xff]  ;;  %v2459_v62 = vpack.c.bf16 %v557_v54, %v555_v53 }
  0x68   : > { %2580 = vmatpush1.bf16.msra.mxu0 %v3410_v38  ;;  %2454 = vmatprep.subr.bf16.mxu1 %v2453_v39  ;;  %4466 = vst [vmem:[#allocation11_spill] sm:$0xff] %v3416_v51  ;;  %v562_v59 = vld [vmem:[#allocation5 + $0xb8] sm:$0xff]  ;;  %v688_v60 = vld [vmem:[#allocation5 + $0x4a8] sm:$0xff]  ;;  %v3422_v63 = vpack.c.bf16 %v685_v57, %v683_v55  ;;  %v559_v1 = vld [vmem:[#allocation5 + $0xa0] sm:$0xff] }
  0x69   : > { %2582 = vmatprep.subr.bf16.mxu0 %v3413_v43  ;;  %4467 = vst [vmem:[#allocation12_spill] sm:$0xff] %v3419_v56  ;;  %v690_v61 = vld [vmem:[#allocation5 + $0x4b8] sm:$0xff]  ;;  %v2461_v0 = vpack.c.bf16 %v562_v59, %v560_v58  ;;  %v561_v2 = vld [vmem:[#allocation5 + $0xb0] sm:$0xff]  ;;  %v687_v3 = vld [vmem:[#allocation5 + $0x4a0] sm:$0xff] }
  0x6a   : > { %4468 = vst [vmem:[#allocation13_spill] sm:$0xff] %v3422_v63  ;;  %v3425_v4 = vpack.c.bf16 %v690_v61, %v688_v60  ;;  %v689_v5 = vld [vmem:[#allocation5 + $0x4b0] sm:$0xff]  ;;  %v564_v6 = vld [vmem:[#allocation5 + $0xc8] sm:$0xff]  ;;  %v566_v8 = vld [vmem:[#allocation5 + $0xd8] sm:$0xff]  ;;  %v2463_v11 = vpack.c.bf16 %v561_v2, %v559_v1 }
  0x6b   : > { %2456 = vmatpush1.bf16.msra.mxu1 %v2455_v50  ;;  %v692_v9 = vld [vmem:[#allocation5 + $0x4c8] sm:$0xff]  ;;  %v694_v10 = vld [vmem:[#allocation5 + $0x4d8] sm:$0xff]  ;;  %v3428_v13 = vpack.c.bf16 %v689_v5, %v687_v3  ;;  %v2465_v14 = vpack.c.bf16 %v566_v8, %v564_v6  ;;  %v563_v15 = vld [vmem:[#allocation5 + $0xc0] sm:$0xff] }
  0x6c   : > { %2584 = vmatpush1.bf16.msra.mxu0 %v3416_v51  ;;  %2458 = vmatprep.subr.bf16.mxu1 %v2457_v52  ;;  %4469 = vst [vmem:[#allocation14_spill] sm:$0xff] %v3425_v4  ;;  %v565_v16 = vld [vmem:[#allocation5 + $0xd0] sm:$0xff]  ;;  %v691_v18 = vld [vmem:[#allocation5 + $0x4c0] sm:$0xff]  ;;  %v3431_v19 = vpack.c.bf16 %v694_v10, %v692_v9  ;;  %v568_v21 = vld [vmem:[#allocation5 + $0xe8] sm:$0xff] }
  0x6d   : > { %2586 = vmatprep.subr.bf16.mxu0 %v3419_v56  ;;  %4470 = vst [vmem:[#allocation15_spill] sm:$0xff] %v3428_v13  ;;  %v693_v20 = vld [vmem:[#allocation5 + $0x4d0] sm:$0xff]  ;;  %v570_v22 = vld [vmem:[#allocation5 + $0xf8] sm:$0xff]  ;;  %v696_v23 = vld [vmem:[#allocation5 + $0x4e8] sm:$0xff]  ;;  %v2467_v26 = vpack.c.bf16 %v565_v16, %v563_v15 }
  0x6e   : > { %4471 = vst [vmem:[#allocation16_spill] sm:$0xff] %v3431_v19  ;;  %v698_v24 = vld [vmem:[#allocation5 + $0x4f8] sm:$0xff]  ;;  %v3434_v27 = vpack.c.bf16 %v693_v20, %v691_v18  ;;  %v2469_v28 = vpack.c.bf16 %v570_v22, %v568_v21  ;;  %v567_v29 = vld [vmem:[#allocation5 + $0xe0] sm:$0xff]  ;;  %v569_v31 = vld [vmem:[#allocation5 + $0xf0] sm:$0xff] }
  0x6f   : > { %2460 = vmatpush1.bf16.msra.mxu1 %v2459_v62  ;;  %v695_v32 = vld [vmem:[#allocation5 + $0x4e0] sm:$0xff]  ;;  %v3437_v33 = vpack.c.bf16 %v698_v24, %v696_v23  ;;  %v697_v34 = vld [vmem:[#allocation5 + $0x4f0] sm:$0xff]  ;;  %v572_v35 = vld [vmem:[#allocation5 + $0x108] sm:$0xff]  ;;  %v2471_v40 = vpack.c.bf16 %v569_v31, %v567_v29 }
  0x70   : > { %2588 = vmatpush1.bf16.msra.mxu0 %v3422_v63  ;;  %2462 = vmatprep.subr.bf16.mxu1 %v2461_v0  ;;  %4472 = vst [vmem:[#allocation17_spill] sm:$0xff] %v3434_v27  ;;  %v574_v36 = vld [vmem:[#allocation5 + $0x118] sm:$0xff]  ;;  %v700_v37 = vld [vmem:[#allocation5 + $0x508] sm:$0xff]  ;;  %v3440_v41 = vpack.c.bf16 %v697_v34, %v695_v32  ;;  %v571_v44 = vld [vmem:[#allocation5 + $0x100] sm:$0xff] }
  0x71   : > { %2590 = vmatprep.subr.bf16.mxu0 %v3425_v4  ;;  %4473 = vst [vmem:[#allocation18_spill] sm:$0xff] %v3437_v33  ;;  %v702_v39 = vld [vmem:[#allocation5 + $0x518] sm:$0xff]  ;;  %v2473_v42 = vpack.c.bf16 %v574_v36, %v572_v35  ;;  %v573_v45 = vld [vmem:[#allocation5 + $0x110] sm:$0xff]  ;;  %v699_v46 = vld [vmem:[#allocation5 + $0x500] sm:$0xff] }
  0x72   : > { %4474 = vst [vmem:[#allocation19_spill] sm:$0xff] %v3440_v41  ;;  %v3443_v47 = vpack.c.bf16 %v702_v39, %v700_v37  ;;  %v701_v48 = vld [vmem:[#allocation5 + $0x510] sm:$0xff]  ;;  %v576_v49 = vld [vmem:[#allocation5 + $0x128] sm:$0xff]  ;;  %v578_v50 = vld [vmem:[#allocation5 + $0x138] sm:$0xff]  ;;  %v2475_v54 = vpack.c.bf16 %v573_v45, %v571_v44 }
  0x73   : > { %2464 = vmatpush1.bf16.msra.mxu1 %v2463_v11  ;;  %v704_v52 = vld [vmem:[#allocation5 + $0x528] sm:$0xff]  ;;  %v706_v53 = vld [vmem:[#allocation5 + $0x538] sm:$0xff]  ;;  %v3446_v55 = vpack.c.bf16 %v701_v48, %v699_v46  ;;  %v2477_v57 = vpack.c.bf16 %v578_v50, %v576_v49  ;;  %v575_v58 = vld [vmem:[#allocation5 + $0x120] sm:$0xff] }
  0x74   : > { %2592 = vmatpush1.bf16.msra.mxu0 %v3428_v13  ;;  %2466 = vmatprep.subr.bf16.mxu1 %v2465_v14  ;;  %4475 = vst [vmem:[#allocation20_spill] sm:$0xff] %v3443_v47  ;;  %v577_v59 = vld [vmem:[#allocation5 + $0x130] sm:$0xff]  ;;  %v703_v60 = vld [vmem:[#allocation5 + $0x520] sm:$0xff]  ;;  %v3449_v61 = vpack.c.bf16 %v706_v53, %v704_v52  ;;  %v580_v0 = vld [vmem:[#allocation5 + $0x148] sm:$0xff] }
  0x75   : > { %2594 = vmatprep.subr.bf16.mxu0 %v3431_v19  ;;  %4476 = vst [vmem:[#allocation21_spill] sm:$0xff] %v3446_v55  ;;  %v705_v62 = vld [vmem:[#allocation5 + $0x530] sm:$0xff]  ;;  %v582_v1 = vld [vmem:[#allocation5 + $0x158] sm:$0xff]  ;;  %v708_v2 = vld [vmem:[#allocation5 + $0x548] sm:$0xff]  ;;  %v2479_v5 = vpack.c.bf16 %v577_v59, %v575_v58 }
  0x76   : > { %4477 = vst [vmem:[#allocation22_spill] sm:$0xff] %v3449_v61  ;;  %v710_v3 = vld [vmem:[#allocation5 + $0x558] sm:$0xff]  ;;  %v3452_v6 = vpack.c.bf16 %v705_v62, %v703_v60  ;;  %v2481_v8 = vpack.c.bf16 %v582_v1, %v580_v0  ;;  %v579_v9 = vld [vmem:[#allocation5 + $0x140] sm:$0xff]  ;;  %v581_v10 = vld [vmem:[#allocation5 + $0x150] sm:$0xff] }
  0x77   : > { %2468 = vmatpush1.bf16.msra.mxu1 %v2467_v26  ;;  %v707_v11 = vld [vmem:[#allocation5 + $0x540] sm:$0xff]  ;;  %v3455_v14 = vpack.c.bf16 %v710_v3, %v708_v2  ;;  %v709_v15 = vld [vmem:[#allocation5 + $0x550] sm:$0xff]  ;;  %v584_v16 = vld [vmem:[#allocation5 + $0x168] sm:$0xff]  ;;  %v2483_v22 = vpack.c.bf16 %v581_v10, %v579_v9 }
  0x78   : > { %2596 = vmatpush1.bf16.msra.mxu0 %v3434_v27  ;;  %2470 = vmatprep.subr.bf16.mxu1 %v2469_v28  ;;  %4478 = vst [vmem:[#allocation23_spill] sm:$0xff] %v3452_v6  ;;  %v586_v18 = vld [vmem:[#allocation5 + $0x178] sm:$0xff]  ;;  %v712_v20 = vld [vmem:[#allocation5 + $0x568] sm:$0xff]  ;;  %v583_v23 = vld [vmem:[#allocation5 + $0x160] sm:$0xff]  ;;  %v3458_v28 = vpack.c.bf16 %v709_v15, %v707_v11 }
  0x79   : > { %2598 = vmatprep.subr.bf16.mxu0 %v3437_v33  ;;  %4479 = vst [vmem:[#allocation24_spill] sm:$0xff] %v3455_v14  ;;  %v714_v21 = vld [vmem:[#allocation5 + $0x578] sm:$0xff]  ;;  %v585_v24 = vld [vmem:[#allocation5 + $0x170] sm:$0xff]  ;;  %v711_v26 = vld [vmem:[#allocation5 + $0x560] sm:$0xff]  ;;  %v2485_v29 = vpack.c.bf16 %v586_v18, %v584_v16 }
  0x7a   : > { %4480 = vst [vmem:[#allocation25_spill] sm:$0xff] %v3458_v28  ;;  %v713_v31 = vld [vmem:[#allocation5 + $0x570] sm:$0xff]  ;;  %v588_v32 = vld [vmem:[#allocation5 + $0x188] sm:$0xff]  ;;  %v590_v34 = vld [vmem:[#allocation5 + $0x198] sm:$0xff]  ;;  %v3461_v35 = vpack.c.bf16 %v714_v21, %v712_v20  ;;  %v2487_v46 = vpack.c.bf16 %v585_v24, %v583_v23 }
  0x7b   : > { %2472 = vmatpush1.bf16.msra.mxu1 %v2471_v40  ;;  %v716_v36 = vld [vmem:[#allocation5 + $0x588] sm:$0xff]  ;;  %v718_v37 = vld [vmem:[#allocation5 + $0x598] sm:$0xff]  ;;  %v3464_v39 = vld [vmem:[%s3386_s3] sm:$0xff]  ;;  %v3480_v52 = vpack.c.bf16 %v713_v31, %v711_v26  ;;  %v2489_v53 = vpack.c.bf16 %v590_v34, %v588_v32 }
  0x7c   : > { %2600 = vmatpush1.bf16.msra.mxu0 %v3440_v41  ;;  %2474 = vmatprep.subr.bf16.mxu1 %v2473_v42  ;;  %4481 = vst [vmem:[#allocation26_spill] sm:$0xff] %v3461_v35  ;;  %v3467_v40 = vld [vmem:[%s3386_s3 + $0x8] sm:$0xff]  ;;  %v280_v42 = vrot.slane %v3464_v39, 1  ;;  %v3471_v44 = vld [vmem:[%s3386_s3 + $0x18] sm:$0xff]  ;;  %v3474_v45 = vld [vmem:[%s3386_s3 + $0x20] sm:$0xff]  ;;  %v3483_v59 = vpack.c.bf16 %v718_v37, %v716_v36 }
  0x7d   : > { %2602 = vmatprep.subr.bf16.mxu0 %v3443_v47  ;;  %v281_v48 = vrot.slane %v3467_v40, 1  ;;  %v398_v49 = vrot.slane %v3471_v44, 2  ;;  %v4401_v50 = vrot.slane %v3474_v45, 2  ;;  %4482 = vst [vmem:[#allocation27_spill] sm:$0xff] %v3480_v52  ;;  %v715_v58 = vld [vmem:[#allocation5 + $0x580] sm:$0xff]  ;;  %v717_v60 = vld [vmem:[#allocation5 + $0x590] sm:$0xff] }
  0x7e   : > { %4483 = vst [vmem:[#allocation28_spill] sm:$0xff] %v3483_v59  ;;  %v592_v62 = vld [vmem:[#allocation5 + $0x1a8] sm:$0xff]  ;;  %v594_v0 = vld [vmem:[#allocation5 + $0x1b8] sm:$0xff]  ;;  %v3495_v9 = vpack.c.bf16 %v717_v60, %v715_v58  ;;  %v591_v11 = vld [vmem:[#allocation5 + $0x1a0] sm:$0xff] }
  0x7f   : > { %2476 = vmatpush1.bf16.msra.mxu1 %v2475_v54  ;;  %v587_v54 = vld [vmem:[#allocation5 + $0x180] sm:$0xff]  ;;  %v282_v1 = vsel %vm279_vm0, %v280_v42, %v281_v48  ;;  %v3491_v2 = vsel %vm392_vm1, %v398_v49, %v4401_v50  ;;  %v720_v3 = vld [vmem:[#allocation5 + $0x5a8] sm:$0xff]  ;;  %v2493_v10 = vpack.c.bf16 %v594_v0, %v592_v62  ;;  %v593_v15 = vld [vmem:[#allocation5 + $0x1b0] sm:$0xff] }
  0x80   : > { %2604 = vmatpush1.bf16.msra.mxu0 %v3446_v55  ;;  %2478 = vmatprep.subr.bf16.mxu1 %v2477_v57  ;;  %v589_v57 = vld [vmem:[#allocation5 + $0x190] sm:$0xff]  ;;  %4484 = vst [vmem:[#allocation29_spill] sm:$0xff] %v3495_v9  ;;  %v719_v16 = vld [vmem:[#allocation5 + $0x5a0] sm:$0xff]  ;;  %v596_v21 = vld [vmem:[#allocation5 + $0x1c8] sm:$0xff]  ;;  %v2495_v26 = vpack.c.bf16 %v593_v15, %v591_v11 }
  0x81   : > { %2606 = vmatprep.subr.bf16.mxu0 %v3449_v61  ;;  %891 = vmatprep.mubr.f32.mxu1 %v282_v1  ;;  %v721_v20 = vld [vmem:[#allocation5 + $0x5b0] sm:$0xff]  ;;  %v724_v23 = vld [vmem:[#allocation5 + $0x5c8] sm:$0xff]  ;;  %v726_v24 = vld [vmem:[#allocation5 + $0x5d8] sm:$0xff] }
  0x82   : > { %1405 = vmatprep.mubr.f32.mxu0 %v3491_v2  ;;  %v595_v32 = vld [vmem:[#allocation5 + $0x1c0] sm:$0xff]  ;;  %v597_v34 = vld [vmem:[#allocation5 + $0x1d0] sm:$0xff]  ;;  %v3504_v37 = vpack.c.bf16 %v726_v24, %v724_v23  ;;  %v602_v49 = vld [vmem:[#allocation5 + $0x1f8] sm:$0xff]  ;;  %v285_v24 = vrot.slane %v3471_v44, 1 }
  0x83   : > { %2480 = vmatpush1.bf16.msra.mxu1 %v2479_v5  ;;  %v722_v5 = vld [vmem:[#allocation5 + $0x5b8] sm:$0xff]  ;;  %v723_v36 = vld [vmem:[#allocation5 + $0x5c0] sm:$0xff]  ;;  %v725_v42 = vld [vmem:[#allocation5 + $0x5d0] sm:$0xff] }
  0x84   : > { %2608 = vmatpush1.bf16.msra.mxu0 %v3452_v6  ;;  %2482 = vmatprep.subr.bf16.mxu1 %v2481_v8  ;;  %v2491_v8 = vpack.c.bf16 %v589_v57, %v587_v54  ;;  %v3498_v18 = vpack.c.bf16 %v722_v5, %v720_v3  ;;  %4487 = vst [vmem:[#allocation32_spill] sm:$0xff] %v3504_v37  ;;  %v730_v54 = vld [vmem:[#allocation5 + $0x5f8] sm:$0xff]  ;;  %v599_v62 = vld [vmem:[#allocation5 + $0x1e0] sm:$0xff]  ;;  %v601_v0 = vld [vmem:[#allocation5 + $0x1f0] sm:$0xff] }
  0x85   : > { %2610 = vmatprep.subr.bf16.mxu0 %v3455_v14  ;;  %v2499_v57 = vpack.c.bf16 %v597_v34, %v595_v32  ;;  %v3507_v58 = vpack.c.bf16 %v725_v42, %v723_v36  ;;  %v727_v1 = vld [vmem:[#allocation5 + $0x5e0] sm:$0xff]  ;;  %v729_v5 = vld [vmem:[#allocation5 + $0x5f0] sm:$0xff]  ;;  %v732_v11 = vld [vmem:[#allocation5 + $0x608] sm:$0xff] }
  0x86   : > { %4485 = vst [vmem:[#allocation30_spill] sm:$0xff] %v3498_v18  ;;  %v734_v15 = vld [vmem:[#allocation5 + $0x618] sm:$0xff]  ;;  %v605_v32 = vld [vmem:[#allocation5 + $0x210] sm:$0xff]  ;;  %v731_v36 = vld [vmem:[#allocation5 + $0x600] sm:$0xff] }
  0x87   : > { %2484 = vmatpush1.bf16.msra.mxu1 %v2483_v22  ;;  %v598_v22 = vld [vmem:[#allocation5 + $0x1d8] sm:$0xff]  ;;  %4488 = vst [vmem:[#allocation33_spill] sm:$0xff] %v3507_v58  ;;  %v2633_v34 = vpack.c.bf16 %v734_v15, %v732_v11  ;;  %v733_v42 = vld [vmem:[#allocation5 + $0x610] sm:$0xff]  ;;  %v735_v50 = vld [vmem:[#allocation5 + $0x620] sm:$0xff] }
  0x88   : > { %2612 = vmatpush1.bf16.msra.mxu0 %v3458_v28  ;;  %2486 = vmatprep.subr.bf16.mxu1 %v2485_v29  ;;  %v3501_v29 = vpack.c.bf16 %v721_v20, %v719_v16  ;;  %v2497_v31 = vpack.c.bf16 %v598_v22, %v596_v21  ;;  %v3513_v16 = vld [vmem:[%s3386_s3 + $0x10] sm:$0x3]  ;;  %v2503_v20 = vpack.c.bf16 %v601_v0, %v599_v62  ;;  %v182_v21 = vld [vmem:[%s3386_s3 + $0x28] sm:$0x3]  ;;  %v3529_v0 = vld [vmem:[%s3386_s3 + $0x38] sm:$0xff] }
  0x89   : > { %2614 = vmatprep.subr.bf16.mxu0 %v3461_v35  ;;  %v3517_v22 = vpack.c.bf16 %v729_v5, %v727_v1  ;;  %v3526_v62 = vld [vmem:[%s3386_s3 + $0x30] sm:$0xff]  ;;  %v608_v5 = vld [vmem:[#allocation5 + $0x228] sm:$0xff]  ;;  %v2635_v11 = vpack.c.bf16 %v733_v42, %v731_v36  ;;  %v288_v15 = vrot.slane %v182_v21, 1  ;;  %v3545_v42 = vld [vmem:[%s3386_s3 + $0x40] sm:$0x3] }
  0x8a   : > { %4486 = vst [vmem:[#allocation31_spill] sm:$0xff] %v3501_v29  ;;  %v609_v36 = vld [vmem:[#allocation5 + $0x230] sm:$0xff]  ;;  %v758_v35 = vld [vmem:[#allocation5 + $0x6d8] sm:$0xff]  ;;  %v764_v55 = vld [vmem:[#allocation5 + $0x708] sm:$0xff] }
  0x8b   : > { %2488 = vmatpush1.bf16.msra.mxu1 %v2487_v46  ;;  %v600_v46 = vld [vmem:[#allocation5 + $0x1e8] sm:$0xff]  ;;  %4490 = vst [vmem:[#allocation35_spill] sm:$0xff] %v3517_v22  ;;  %v762_v14 = vld [vmem:[#allocation5 + $0x6f8] sm:$0xff]  ;;  %v3669_v41 = vld [vmem:[%s3386_s3 + $0x90] sm:$0xff] }
  0x8c   : > { %2616 = vmatpush1.bf16.msra.mxu0 %v3480_v52  ;;  %2490 = vmatprep.subr.bf16.mxu1 %v2489_v53  ;;  %v728_v53 = vld [vmem:[#allocation5 + $0x5e8] sm:$0xff]  ;;  %v2501_v60 = vpack.c.bf16 %v602_v49, %v600_v46  ;;  %v283_v46 = vrot.slane %v3513_v16, 1  ;;  %v3739_v4 = vld [vmem:[%s3386_s3 + $0xc0] sm:$0xff] }
  0x8d   : > { %2618 = vmatprep.subr.bf16.mxu0 %v3483_v59  ;;  %v3510_v3 = vpack.c.bf16 %v730_v54, %v728_v53  ;;  %v736_v49 = vld [vmem:[#allocation5 + $0x628] sm:$0xff]  ;;  %v393_v53 = vrot.slane %v3464_v39, 2  ;;  %v737_v54 = vld [vmem:[#allocation5 + $0x630] sm:$0xff]  ;;  %v619_v59 = vld [vmem:[#allocation5 + $0x280] sm:$0xff]  ;;  %v433_v63 = vrot.slane %v3739_v4, 2 }
  0x8e   : > { %v756_v52 = vld [vmem:[#allocation5 + $0x6c8] sm:$0xff] }
  0x8f   : > { %2492 = vmatpush1.bf16.msra.mxu1 %v2491_v8  ;;  %4489 = vst [vmem:[#allocation34_spill] sm:$0xff] %v3510_v3  ;;  %v604_v8 = vld [vmem:[#allocation5 + $0x208] sm:$0xff] }
  0x90   : > { %2620 = vmatpush1.bf16.msra.mxu0 %v3495_v9  ;;  %2494 = vmatprep.subr.bf16.mxu1 %v2493_v10  ;;  %v606_v10 = vld [vmem:[#allocation5 + $0x218] sm:$0xff]  ;;  %v772_v33 = vld [vmem:[#allocation5 + $0x748] sm:$0xff] }
  0x91   : > { %2622 = vmatprep.subr.bf16.mxu0 %v3498_v18  ;;  %v2505_v23 = vpack.c.bf16 %v606_v10, %v604_v8  ;;  %v610_v8 = vld [vmem:[#allocation5 + $0x238] sm:$0xff]  ;;  %v613_v18 = vld [vmem:[#allocation5 + $0x250] sm:$0xff]  ;;  %v780_v13 = vld [vmem:[#allocation5 + $0x788] sm:$0xff] }
  0x92   : > { %v750_v9 = vld [vmem:[#allocation5 + $0x698] sm:$0xff]  ;;  %v792_v51 = vld [vmem:[#allocation5 + $0x7e8] sm:$0xff] }
  0x93   : > { %2496 = vmatpush1.bf16.msra.mxu1 %v2495_v26  ;;  %v286_v26 = vrot.slane %v3474_v45, 1  ;;  %v3634_v6 = vld [vmem:[%s3386_s3 + $0x78] sm:$0xff] }
  0x94   : > { %2624 = vmatpush1.bf16.msra.mxu0 %v3501_v29  ;;  %2498 = vmatprep.subr.bf16.mxu1 %v2497_v31  ;;  %v603_v31 = vld [vmem:[#allocation5 + $0x200] sm:$0xff]  ;;  %v418_v61 = vrot.slane %v3634_v6, 2 }
  0x95   : > { %2626 = vmatprep.subr.bf16.mxu0 %v3504_v37  ;;  %v2507_v1 = vpack.c.bf16 %v605_v32, %v603_v31  ;;  %v287_v10 = vsel %vm279_vm0, %v285_v24, %v286_v26  ;;  %v404_v31 = vrot.slane %v3529_v0, 2  ;;  %v740_v32 = vld [vmem:[#allocation5 + $0x648] sm:$0xff]  ;;  %v2509_v24 = vpack.c.bf16 %v610_v8, %v608_v5  ;;  %v741_v37 = vld [vmem:[#allocation5 + $0x650] sm:$0xff]  ;;  %v611_v29 = vld [vmem:[#allocation5 + $0x240] sm:$0xff] }
  0x96   : > { %v290_v5 = vrot.slane %v3526_v62, 1  ;;  %v291_v8 = vrot.slane %v3529_v0, 1 }
  0x97   : > { %2500 = vmatpush1.bf16.msra.mxu1 %v2499_v57  ;;  %v401_v57 = vrot.slane %v182_v21, 2 }
  0x98   : > { %2628 = vmatpush1.bf16.msra.mxu0 %v3507_v58  ;;  %2502 = vmatprep.subr.bf16.mxu1 %v2501_v60  ;;  %v738_v60 = vld [vmem:[#allocation5 + $0x638] sm:$0xff] }
  0x99   : > { %2630 = vmatprep.subr.bf16.mxu0 %v3510_v3  ;;  %v284_v3 = vsel %vm279_vm0, %v281_v48, %v283_v46  ;;  %v2637_v58 = vpack.c.bf16 %v738_v60, %v736_v49  ;;  %v4492_v48 = vrot.slane %v3467_v40, 2  ;;  %v2639_v49 = vpack.c.bf16 %v737_v54, %v735_v50  ;;  %v612_v60 = vld [vmem:[#allocation5 + $0x248] sm:$0xff] }
  0x9b   : > { %2504 = vmatpush1.bf16.msra.mxu1 %v2503_v20  ;;  %v403_v20 = vrot.slane %v3526_v62, 2  ;;  %v3550_v46 = vsel %vm392_vm1, %v393_v53, %v4492_v48  ;;  %v396_v53 = vrot.slane %v3513_v16, 2  ;;  %v3566_v48 = vld [vmem:[%s3386_s3 + $0x50] sm:$0xff] }
  0x9c   : > { %2632 = vmatpush1.bf16.msra.mxu0 %v3517_v22  ;;  %2506 = vmatprep.subr.bf16.mxu1 %v2505_v23  ;;  %v742_v22 = vld [vmem:[#allocation5 + $0x658] sm:$0xff]  ;;  %v4491_v23 = vrot.slane %v3474_v45, 2 }
  0x9d   : > { %2634 = vmatprep.subr.bf16.mxu0 %v2633_v34  ;;  %v607_v34 = vld [vmem:[#allocation5 + $0x220] sm:$0xff]  ;;  %v3558_v50 = vsel %vm392_vm1, %v403_v20, %v404_v31  ;;  %v2641_v54 = vpack.c.bf16 %v742_v22, %v740_v32  ;;  %v618_v20 = vld [vmem:[#allocation5 + $0x278] sm:$0xff]  ;;  %v4494_v22 = vrot.slane %v3467_v40, 2 }
  0x9e   : > { %892 = vmatmul.mubr.f32.vlgmr.msra.gmra.mrb[0].mxu1 %v3464_v39  ;;  %v3542_v21 = vsel %vm392_vm1, %v4491_v23, %v401_v57  ;;  %v614_v39 = vld [vmem:[#allocation5 + $0x258] sm:$0xff]  ;;  %v289_v57 = vsel %vm279_vm0, %v286_v26, %v288_v15  ;;  %v739_v23 = vld [vmem:[#allocation5 + $0x640] sm:$0xff]  ;;  %4493 = vst [vmem:[#allocation36_spill] sm:$0xff] %v3558_v50  ;;  %v744_v26 = vld [vmem:[#allocation5 + $0x668] sm:$0xff] }
  0x9f   : > { %1406 = vmatmul.mubr.f32.vlgmr.msra.gmra.mrb[0].mxu0 %v287_v10  ;;  %2508 = vmatpush1.bf16.msra.mxu1 %v2507_v1  ;;  %v2511_v1 = vpack.c.bf16 %v609_v36, %v607_v34  ;;  %v3562_v15 = vld [vmem:[%s3386_s3 + $0x48] sm:$0xff]  ;;  %v2513_v16 = vpack.c.bf16 %v614_v39, %v612_v60  ;;  %v3571_v32 = vsel %vm392_vm1, %v4494_v22, %v396_v53  ;;  %v293_v36 = vrot.slane %v3545_v42, 1  ;;  %v743_v39 = vld [vmem:[#allocation5 + $0x660] sm:$0xff] }
  0xa0   : > { %2636 = vmatpush1.bf16.msra.mxu0 %v2635_v11  ;;  %897 = vmatprep.mubr.f32.mxu1 %v284_v3  ;;  %v406_v3 = vrot.slane %v3545_v42, 2  ;;  %v746_v11 = vld [vmem:[#allocation5 + $0x678] sm:$0xff]  ;;  %v3575_v34 = vsel %vm279_vm0, %v290_v5, %v291_v8  ;;  %v408_v53 = vrot.slane %v3562_v15, 2  ;;  %v748_v22 = vld [vmem:[#allocation5 + $0x688] sm:$0xff]  ;;  %v2515_v5 = vpack.c.bf16 %v613_v18, %v611_v29 }
  0xa1   : > { %1411 = vmatprep.mubr.f32.mxu0 %v3542_v21  ;;  %2638 = vmatprep.subr.bf16.mxu0 %v2637_v58  ;;  %v616_v58 = vld [vmem:[#allocation5 + $0x268] sm:$0xff]  ;;  %v2645_v60 = vpack.c.bf16 %v746_v11, %v744_v26  ;;  %v295_v18 = vrot.slane %v3562_v15, 1  ;;  %v296_v29 = vrot.slane %v3566_v48, 1  ;;  %v747_v26 = vld [vmem:[#allocation5 + $0x680] sm:$0xff]  ;;  %v749_v11 = vld [vmem:[#allocation5 + $0x690] sm:$0xff] }
  0xa2   : > { %898 = vmatmul.mubr.f32.gmra.mrb[2].mxu1 %v3467_v40  ;;  %2510 = vmatprep.subr.bf16.mxu1 %v2509_v24  ;;  %v2643_v24 = vpack.c.bf16 %v741_v37, %v739_v23  ;;  %v745_v40 = vld [vmem:[#allocation5 + $0x670] sm:$0xff]  ;;  %v3585_v37 = vld [vmem:[%s3386_s3 + $0x58] sm:$0x3]  ;;  %v2517_v42 = vpack.c.bf16 %v618_v20, %v616_v58  ;;  %v615_v23 = vld [vmem:[#allocation5 + $0x260] sm:$0xff] }
  0xa3   : > { %1412 = vmatmul.mubr.f32.gmra.mrb[2].mxu0 %v289_v57  ;;  %903 = vmatprep.mubr.f32.mxu1 %v287_v10  ;;  %v3579_v10 = vsel %vm392_vm1, %v404_v31, %v406_v3  ;;  %v620_v31 = vld [vmem:[#allocation5 + $0x288] sm:$0xff]  ;;  %v3590_v3 = vsel %vm279_vm0, %v291_v8, %v293_v36  ;;  %v411_v58 = vrot.slane %v3585_v37, 2  ;;  %v3599_v8 = vld [vmem:[%s3386_s3 + $0x60] sm:$0xff] }
  0xa4   : > { %2640 = vmatpush1.bf16.msra.mxu0 %v2639_v49  ;;  %1417 = vmatprep.mubr.f32.mxu0 %v3558_v50  ;;  %4495 = vst [vmem:[#allocation37_spill] sm:$0xff] %v3579_v10  ;;  %v409_v49 = vrot.slane %v3566_v48, 2  ;;  %v752_v20 = vld [vmem:[#allocation5 + $0x6a8] sm:$0xff] }
  0xa5   : > { %2642 = vmatprep.subr.bf16.mxu0 %v2641_v54  ;;  %2512 = vmatpush1.bf16.msra.mxu1 %v2511_v1  ;;  %v617_v54 = vld [vmem:[#allocation5 + $0x270] sm:$0xff]  ;;  %v622_v1 = vld [vmem:[#allocation5 + $0x298] sm:$0xff]  ;;  %v788_v50 = vld [vmem:[#allocation5 + $0x7c8] sm:$0xff] }
  0xa6   : > { %904 = vmatmul.mubr.f32.gmra.mrb[4].mxu1 %v3471_v44  ;;  %2514 = vmatprep.subr.bf16.mxu1 %v2513_v16  ;;  %v2647_v44 = vpack.c.bf16 %v745_v40, %v743_v39  ;;  %v2649_v16 = vpack.c.bf16 %v750_v9, %v748_v22  ;;  %v2519_v36 = vpack.c.bf16 %v617_v54, %v615_v23  ;;  %v3603_v39 = vld [vmem:[%s3386_s3 + $0x68] sm:$0xff]  ;;  %v751_v23 = vld [vmem:[#allocation5 + $0x6a0] sm:$0xff] }
  0xa7   : > { %1418 = vmatmul.mubr.f32.gmra.mrb[4].mxu0 %v3575_v34  ;;  %909 = vmatprep.mubr.f32.mxu1 %v289_v57  ;;  %v3595_v57 = vsel %vm392_vm1, %v408_v53, %v409_v49  ;;  %v2521_v40 = vpack.c.bf16 %v622_v1, %v620_v31  ;;  %v624_v9 = vld [vmem:[#allocation5 + $0x2a8] sm:$0xff]  ;;  %v626_v53 = vld [vmem:[#allocation5 + $0x2b8] sm:$0xff]  ;;  %v3609_v22 = vsel %vm279_vm0, %v295_v18, %v296_v29  ;;  %v753_v31 = vld [vmem:[#allocation5 + $0x6b0] sm:$0xff]  ;;  %v413_v1 = vrot.slane %v3599_v8, 2 }
  0xa8   : > { %2644 = vmatpush1.bf16.msra.mxu0 %v2643_v24  ;;  %1423 = vmatprep.mubr.f32.mxu0 %v3579_v10  ;;  %4496 = vst [vmem:[#allocation38_spill] sm:$0xff] %v3595_v57  ;;  %v754_v24 = vld [vmem:[#allocation5 + $0x6b8] sm:$0xff]  ;;  %v3613_v54 = vsel %vm392_vm1, %v409_v49, %v411_v58  ;;  %v3619_v18 = vld [vmem:[%s3386_s3 + $0x70] sm:$0x3]  ;;  %v628_v49 = vld [vmem:[#allocation5 + $0x2c8] sm:$0xff]  ;;  %v2655_v58 = vpack.c.bf16 %v753_v31, %v751_v23 }
  0xa9   : > { %2646 = vmatprep.subr.bf16.mxu0 %v2645_v60  ;;  %2516 = vmatpush1.bf16.msra.mxu1 %v2515_v5  ;;  %v621_v60 = vld [vmem:[#allocation5 + $0x290] sm:$0xff]  ;;  %v298_v5 = vrot.slane %v3585_v37, 1  ;;  %4497 = vst [vmem:[#allocation39_spill] sm:$0xff] %v3613_v54  ;;  %v2525_v37 = vpack.c.bf16 %v626_v53, %v624_v9  ;;  %v2657_v9 = vpack.c.bf16 %v758_v35, %v756_v52  ;;  %v416_v53 = vrot.slane %v3619_v18, 2  ;;  %v627_v31 = vld [vmem:[#allocation5 + $0x2c0] sm:$0xff]  ;;  %v632_v35 = vld [vmem:[#allocation5 + $0x2e8] sm:$0xff] }
  0xaa   : > { %910 = vmatmul.mubr.f32.gmra.mrb[6].mxu1 %v3474_v45  ;;  %2518 = vmatprep.subr.bf16.mxu1 %v2517_v42  ;;  %v2651_v45 = vpack.c.bf16 %v749_v11, %v747_v26  ;;  %v2653_v42 = vpack.c.bf16 %v754_v24, %v752_v20  ;;  %v2523_v28 = vpack.c.bf16 %v621_v60, %v619_v59  ;;  %v623_v26 = vld [vmem:[#allocation5 + $0x2a0] sm:$0xff]  ;;  %v625_v11 = vld [vmem:[#allocation5 + $0x2b0] sm:$0xff]  ;;  %v300_v20 = vrot.slane %v3599_v8, 1  ;;  %v634_v52 = vld [vmem:[#allocation5 + $0x2f8] sm:$0xff] }
  0xab   : > { %1424 = vmatmul.mubr.f32.gmra.mrb[6].mxu0 %v3590_v3  ;;  %915 = vmatprep.mubr.f32.mxu1 %v3575_v34  ;;  %v3625_v59 = vsel %vm279_vm0, %v296_v29, %v298_v5  ;;  %v301_v24 = vrot.slane %v3603_v39, 1  ;;  %v2527_v29 = vpack.c.bf16 %v625_v11, %v623_v26  ;;  %v3638_v5 = vld [vmem:[%s3386_s3 + $0x80] sm:$0xff]  ;;  %v303_v26 = vrot.slane %v3619_v18, 1 }
  0xac   : > { %2648 = vmatpush1.bf16.msra.mxu0 %v2647_v44  ;;  %1429 = vmatprep.mubr.f32.mxu0 %v3595_v57  ;;  %v414_v44 = vrot.slane %v3603_v39, 2  ;;  %v759_v11 = vld [vmem:[#allocation5 + $0x6e0] sm:$0xff]  ;;  %v3704_v57 = vld [vmem:[%s3386_s3 + $0xa8] sm:$0xff] }
  0xad   : > { %2650 = vmatprep.subr.bf16.mxu0 %v2649_v16  ;;  %2520 = vmatpush1.bf16.msra.mxu1 %v2519_v36  ;;  %v630_v16 = vld [vmem:[#allocation5 + $0x2d8] sm:$0xff]  ;;  %v755_v36 = vld [vmem:[#allocation5 + $0x6c0] sm:$0xff]  ;;  %v428_v19 = vrot.slane %v3704_v57, 2 }
  0xae   : > { %916 = vmatmul.mubr.f32.gmra.mrb[8].mxu1 %v3526_v62  ;;  %2522 = vmatprep.subr.bf16.mxu1 %v2521_v40  ;;  %v757_v40 = vld [vmem:[#allocation5 + $0x6d0] sm:$0xff]  ;;  %v3630_v60 = vsel %vm392_vm1, %v413_v1, %v414_v44  ;;  %v2529_v23 = vpack.c.bf16 %v630_v16, %v628_v49  ;;  %v3648_v49 = vsel %vm392_vm1, %v414_v44, %v416_v53  ;;  %v631_v18 = vld [vmem:[#allocation5 + $0x2e0] sm:$0xff]  ;;  %v636_v44 = vld [vmem:[#allocation5 + $0x308] sm:$0xff] }
  0xaf   : > { %1430 = vmatmul.mubr.f32.gmra.mrb[8].mxu0 %v3609_v22  ;;  %921 = vmatprep.mubr.f32.mxu1 %v3590_v3  ;;  %4498 = vst [vmem:[#allocation40_spill] sm:$0xff] %v3630_v60  ;;  %v2659_v1 = vpack.c.bf16 %v757_v40, %v755_v36  ;;  %4499 = vst [vmem:[#allocation41_spill] sm:$0xff] %v3648_v49  ;;  %v761_v16 = vld [vmem:[#allocation5 + $0x6f0] sm:$0xff]  ;;  %v638_v40 = vld [vmem:[#allocation5 + $0x318] sm:$0xff] }
  0xb0   : > { %2652 = vmatpush1.bf16.msra.mxu0 %v2651_v45  ;;  %1435 = vmatprep.mubr.f32.mxu0 %v3613_v54  ;;  %v760_v45 = vld [vmem:[#allocation5 + $0x6e8] sm:$0xff]  ;;  %v633_v36 = vld [vmem:[#allocation5 + $0x2f0] sm:$0xff]  ;;  %v2663_v53 = vpack.c.bf16 %v761_v16, %v759_v11  ;;  %v2537_v11 = vpack.c.bf16 %v638_v40, %v636_v44  ;;  %v635_v16 = vld [vmem:[#allocation5 + $0x300] sm:$0xff]  ;;  %v423_v54 = vrot.slane %v3669_v41, 2 }
  0xb1   : > { %2654 = vmatprep.subr.bf16.mxu0 %v2653_v42  ;;  %2524 = vmatpush1.bf16.msra.mxu1 %v2523_v28  ;;  %v629_v42 = vld [vmem:[#allocation5 + $0x2d0] sm:$0xff]  ;;  %v3644_v28 = vsel %vm279_vm0, %v300_v20, %v301_v24  ;;  %v3654_v20 = vld [vmem:[%s3386_s3 + $0x88] sm:$0x3] }
  0xb2   : > { %922 = vmatmul.mubr.f32.gmra.mrb[10].mxu1 %v3529_v0  ;;  %2526 = vmatprep.subr.bf16.mxu1 %v2525_v37  ;;  %v2661_v37 = vpack.c.bf16 %v762_v14, %v760_v45  ;;  %v2531_v47 = vpack.c.bf16 %v629_v42, %v627_v31  ;;  %v2533_v14 = vpack.c.bf16 %v634_v52, %v632_v35  ;;  %v305_v45 = vrot.slane %v3634_v6, 1  ;;  %v765_v31 = vld [vmem:[#allocation5 + $0x710] sm:$0xff] }
  0xb3   : > { %1436 = vmatmul.mubr.f32.gmra.mrb[10].mxu0 %v3625_v59  ;;  %927 = vmatprep.mubr.f32.mxu1 %v3609_v22  ;;  %v421_v52 = vrot.slane %v3654_v20, 2  ;;  %v769_v40 = vld [vmem:[#allocation5 + $0x730] sm:$0xff] }
  0xb4   : > { %2656 = vmatpush1.bf16.msra.mxu0 %v2655_v58  ;;  %1441 = vmatprep.mubr.f32.mxu0 %v3630_v60  ;;  %v419_v58 = vrot.slane %v3638_v5, 2  ;;  %v766_v60 = vld [vmem:[#allocation5 + $0x718] sm:$0xff] }
  0xb5   : > { %2658 = vmatprep.subr.bf16.mxu0 %v2657_v9  ;;  %2528 = vmatpush1.bf16.msra.mxu1 %v2527_v29  ;;  %v3660_v9 = vsel %vm279_vm0, %v301_v24, %v303_v26  ;;  %v306_v29 = vrot.slane %v3638_v5, 1  ;;  %v2665_v35 = vpack.c.bf16 %v766_v60, %v764_v55  ;;  %v2535_v24 = vpack.c.bf16 %v633_v36, %v631_v18  ;;  %v3673_v26 = vld [vmem:[%s3386_s3 + $0x98] sm:$0xff]  ;;  %v767_v36 = vld [vmem:[#allocation5 + $0x720] sm:$0xff] }
  0xb6   : > { %928 = vmatmul.mubr.f32.gmra.mrb[12].mxu1 %v3562_v15  ;;  %2530 = vmatprep.subr.bf16.mxu1 %v2529_v23  ;;  %v763_v23 = vld [vmem:[#allocation5 + $0x700] sm:$0xff]  ;;  %v3665_v42 = vsel %vm392_vm1, %v418_v61, %v419_v58  ;;  %v640_v55 = vld [vmem:[#allocation5 + $0x328] sm:$0xff]  ;;  %v642_v61 = vld [vmem:[#allocation5 + $0x338] sm:$0xff]  ;;  %v308_v18 = vrot.slane %v3654_v20, 1  ;;  %v3683_v44 = vsel %vm392_vm1, %v419_v58, %v421_v52  ;;  %v2671_v52 = vpack.c.bf16 %v769_v40, %v767_v36 }
  0xb7   : > { %1442 = vmatmul.mubr.f32.gmra.mrb[12].mxu0 %v3644_v28  ;;  %933 = vmatprep.mubr.f32.mxu1 %v3625_v59  ;;  %4500 = vst [vmem:[#allocation42_spill] sm:$0xff] %v3665_v42  ;;  %v2667_v60 = vpack.c.bf16 %v765_v31, %v763_v23  ;;  %4501 = vst [vmem:[#allocation43_spill] sm:$0xff] %v3683_v44  ;;  %v639_v20 = vld [vmem:[#allocation5 + $0x320] sm:$0xff]  ;;  %v641_v23 = vld [vmem:[#allocation5 + $0x330] sm:$0xff] }
  0xb8   : > { %2660 = vmatpush1.bf16.msra.mxu0 %v2659_v1  ;;  %1447 = vmatprep.mubr.f32.mxu0 %v3648_v49  ;;  %v768_v1 = vld [vmem:[#allocation5 + $0x728] sm:$0xff]  ;;  %v770_v49 = vld [vmem:[#allocation5 + $0x738] sm:$0xff]  ;;  %v643_v40 = vld [vmem:[#allocation5 + $0x340] sm:$0xff] }
  0xb9   : > { %2662 = vmatprep.subr.bf16.mxu0 %v2661_v37  ;;  %2532 = vmatpush1.bf16.msra.mxu1 %v2531_v47  ;;  %v637_v37 = vld [vmem:[#allocation5 + $0x310] sm:$0xff]  ;;  %v3679_v47 = vsel %vm279_vm0, %v305_v45, %v306_v29  ;;  %v644_v58 = vld [vmem:[#allocation5 + $0x348] sm:$0xff]  ;;  %v646_v31 = vld [vmem:[#allocation5 + $0x358] sm:$0xff] }
  0xba   : > { %934 = vmatmul.mubr.f32.gmra.mrb[14].mxu1 %v3566_v48  ;;  %2534 = vmatprep.subr.bf16.mxu1 %v2533_v14  ;;  %v2669_v14 = vpack.c.bf16 %v770_v49, %v768_v1  ;;  %v2539_v27 = vpack.c.bf16 %v637_v37, %v635_v16  ;;  %v3689_v45 = vld [vmem:[%s3386_s3 + $0xa0] sm:$0x3]  ;;  %v2541_v49 = vpack.c.bf16 %v642_v61, %v640_v55  ;;  %v310_v1 = vrot.slane %v3669_v41, 1 }
  0xbb   : > { %1448 = vmatmul.mubr.f32.gmra.mrb[14].mxu0 %v3660_v9  ;;  %939 = vmatprep.mubr.f32.mxu1 %v3644_v28  ;;  %v773_v16 = vld [vmem:[#allocation5 + $0x750] sm:$0xff]  ;;  %v426_v61 = vrot.slane %v3689_v45, 2  ;;  %v2545_v36 = vpack.c.bf16 %v646_v31, %v644_v58 }
  0xbc   : > { %2664 = vmatpush1.bf16.msra.mxu0 %v2663_v53  ;;  %1453 = vmatprep.mubr.f32.mxu0 %v3665_v42  ;;  %v424_v53 = vrot.slane %v3673_v26, 2  ;;  %v774_v42 = vld [vmem:[#allocation5 + $0x758] sm:$0xff]  ;;  %v777_v31 = vld [vmem:[#allocation5 + $0x770] sm:$0xff] }
  0xbd   : > { %2666 = vmatprep.subr.bf16.mxu0 %v2665_v35  ;;  %2536 = vmatpush1.bf16.msra.mxu1 %v2535_v24  ;;  %v3695_v35 = vsel %vm279_vm0, %v306_v29, %v308_v18  ;;  %v311_v24 = vrot.slane %v3673_v26, 1  ;;  %v2673_v55 = vpack.c.bf16 %v774_v42, %v772_v33  ;;  %v2543_v29 = vpack.c.bf16 %v641_v23, %v639_v20  ;;  %v3708_v18 = vld [vmem:[%s3386_s3 + $0xb0] sm:$0xff]  ;;  %v648_v33 = vld [vmem:[#allocation5 + $0x368] sm:$0xff] }
  0xbe   : > { %940 = vmatmul.mubr.f32.gmra.mrb[16].mxu1 %v3599_v8  ;;  %2538 = vmatprep.subr.bf16.mxu1 %v2537_v11  ;;  %v771_v11 = vld [vmem:[#allocation5 + $0x740] sm:$0xff]  ;;  %v3700_v37 = vsel %vm392_vm1, %v423_v54, %v424_v53  ;;  %v650_v54 = vld [vmem:[#allocation5 + $0x378] sm:$0xff]  ;;  %v313_v20 = vrot.slane %v3689_v45, 1  ;;  %v3718_v58 = vsel %vm392_vm1, %v424_v53, %v426_v61  ;;  %v652_v53 = vld [vmem:[#allocation5 + $0x388] sm:$0xff] }
  0xbf   : > { %1454 = vmatmul.mubr.f32.gmra.mrb[16].mxu0 %v3679_v47  ;;  %945 = vmatprep.mubr.f32.mxu1 %v3660_v9  ;;  %4502 = vst [vmem:[#allocation44_spill] sm:$0xff] %v3700_v37  ;;  %v2675_v42 = vpack.c.bf16 %v773_v16, %v771_v11  ;;  %v775_v23 = vld [vmem:[#allocation5 + $0x760] sm:$0xff]  ;;  %4503 = vst [vmem:[#allocation45_spill] sm:$0xff] %v3718_v58  ;;  %v649_v11 = vld [vmem:[#allocation5 + $0x370] sm:$0xff] }
  0xc0   : > { %2668 = vmatpush1.bf16.msra.mxu0 %v2667_v60  ;;  %1459 = vmatprep.mubr.f32.mxu0 %v3683_v44  ;;  %v776_v60 = vld [vmem:[#allocation5 + $0x768] sm:$0xff]  ;;  %v778_v44 = vld [vmem:[#allocation5 + $0x778] sm:$0xff]  ;;  %v647_v45 = vld [vmem:[#allocation5 + $0x360] sm:$0xff]  ;;  %v2679_v61 = vpack.c.bf16 %v777_v31, %v775_v23 }
  0xc1   : > { %2670 = vmatprep.subr.bf16.mxu0 %v2669_v14  ;;  %2540 = vmatpush1.bf16.msra.mxu1 %v2539_v27  ;;  %v645_v14 = vld [vmem:[#allocation5 + $0x350] sm:$0xff]  ;;  %v3714_v27 = vsel %vm279_vm0, %v310_v1, %v311_v24  ;;  %v3724_v1 = vld [vmem:[%s3386_s3 + $0xb8] sm:$0x3]  ;;  %v651_v31 = vld [vmem:[#allocation5 + $0x380] sm:$0xff] }
  0xc2   : > { %946 = vmatmul.mubr.f32.gmra.mrb[18].mxu1 %v3603_v39  ;;  %2542 = vmatprep.subr.bf16.mxu1 %v2541_v49  ;;  %v2677_v49 = vpack.c.bf16 %v778_v44, %v776_v60  ;;  %v2547_v10 = vpack.c.bf16 %v645_v14, %v643_v40  ;;  %v2549_v44 = vpack.c.bf16 %v650_v54, %v648_v33  ;;  %v654_v16 = vld [vmem:[#allocation5 + $0x398] sm:$0xff]  ;;  %v315_v60 = vrot.slane %v3704_v57, 1  ;;  %v781_v40 = vld [vmem:[#allocation5 + $0x790] sm:$0xff] }
  0xc3   : > { %1460 = vmatmul.mubr.f32.gmra.mrb[18].mxu0 %v3695_v35  ;;  %951 = vmatprep.mubr.f32.mxu1 %v3679_v47  ;;  %v431_v54 = vrot.slane %v3724_v1, 2  ;;  %v2553_v23 = vpack.c.bf16 %v654_v16, %v652_v53  ;;  %v785_v16 = vld [vmem:[#allocation5 + $0x7b0] sm:$0xff] }
  0xc4   : > { %2672 = vmatpush1.bf16.msra.mxu0 %v2671_v52  ;;  %1465 = vmatprep.mubr.f32.mxu0 %v3700_v37  ;;  %v429_v52 = vrot.slane %v3708_v18, 2  ;;  %v782_v37 = vld [vmem:[#allocation5 + $0x798] sm:$0xff] }
  0xc5   : > { %2674 = vmatprep.subr.bf16.mxu0 %v2673_v55  ;;  %2544 = vmatpush1.bf16.msra.mxu1 %v2543_v29  ;;  %v3730_v55 = vsel %vm279_vm0, %v311_v24, %v313_v20  ;;  %v316_v29 = vrot.slane %v3708_v18, 1  ;;  %v2681_v33 = vpack.c.bf16 %v782_v37, %v780_v13  ;;  %v2551_v24 = vpack.c.bf16 %v649_v11, %v647_v45  ;;  %v3743_v20 = vld [vmem:[%s3386_s3 + $0xc8] sm:$0xff]  ;;  %v783_v11 = vld [vmem:[#allocation5 + $0x7a0] sm:$0xff] }
  0xc6   : > { %952 = vmatmul.mubr.f32.gmra.mrb[20].mxu1 %v3634_v6  ;;  %2546 = vmatprep.subr.bf16.mxu1 %v2545_v36  ;;  %v779_v36 = vld [vmem:[#allocation5 + $0x780] sm:$0xff]  ;;  %v3735_v14 = vsel %vm392_vm1, %v428_v19, %v429_v52  ;;  %v656_v13 = vld [vmem:[#allocation5 + $0x3a8] sm:$0xff]  ;;  %v658_v19 = vld [vmem:[#allocation5 + $0x3b8] sm:$0xff]  ;;  %v318_v45 = vrot.slane %v3724_v1, 1  ;;  %v3753_v53 = vsel %vm392_vm1, %v429_v52, %v431_v54  ;;  %v2687_v54 = vpack.c.bf16 %v785_v16, %v783_v11 }
  0xc7   : > { %1466 = vmatmul.mubr.f32.gmra.mrb[20].mxu0 %v3714_v27  ;;  %957 = vmatprep.mubr.f32.mxu1 %v3695_v35  ;;  %4504 = vst [vmem:[#allocation46_spill] sm:$0xff] %v3735_v14  ;;  %v2683_v37 = vpack.c.bf16 %v781_v40, %v779_v36  ;;  %4505 = vst [vmem:[#allocation47_spill] sm:$0xff] %v3753_v53  ;;  %v2557_v1 = vpack.c.bf16 %v658_v19, %v656_v13  ;;  %v657_v36 = vld [vmem:[#allocation5 + $0x3b0] sm:$0xff]  ;;  %v660_v52 = vld [vmem:[#allocation5 + $0x3c8] sm:$0xff] }
  0xc8   : > { %2676 = vmatpush1.bf16.msra.mxu0 %v2675_v42  ;;  %1471 = vmatprep.mubr.f32.mxu0 %v3718_v58  ;;  %v784_v42 = vld [vmem:[#allocation5 + $0x7a8] sm:$0xff]  ;;  %v786_v58 = vld [vmem:[#allocation5 + $0x7b8] sm:$0xff]  ;;  %v789_v13 = vld [vmem:[#allocation5 + $0x7d0] sm:$0xff] }
  0xc9   : > { %2678 = vmatprep.subr.bf16.mxu0 %v2677_v49  ;;  %2548 = vmatpush1.bf16.msra.mxu1 %v2547_v10  ;;  %v653_v49 = vld [vmem:[#allocation5 + $0x390] sm:$0xff]  ;;  %v3749_v10 = vsel %vm279_vm0, %v315_v60, %v316_v29  ;;  %v662_v40 = vld [vmem:[#allocation5 + $0x3d8] sm:$0xff]  ;;  %v659_v11 = vld [vmem:[#allocation5 + $0x3c0] sm:$0xff] }
  0xca   : > { %958 = vmatmul.mubr.f32.gmra.mrb[22].mxu1 %v3638_v5  ;;  %2550 = vmatprep.subr.bf16.mxu1 %v2549_v44  ;;  %v2685_v44 = vpack.c.bf16 %v786_v58, %v784_v42  ;;  %v2555_v56 = vpack.c.bf16 %v653_v49, %v651_v31  ;;  %v203_v60 = vld [vmem:[%s3386_s3 + $0xd0] sm:$0x3]  ;;  %v320_v42 = vrot.slane %v3739_v4, 1 }
  0xcb   : > { %1472 = vmatmul.mubr.f32.gmra.mrb[22].mxu0 %v3730_v55  ;;  %963 = vmatprep.mubr.f32.mxu1 %v3714_v27  ;;  %v655_v58 = vld [vmem:[#allocation5 + $0x3a0] sm:$0xff]  ;;  %v436_v19 = vrot.slane %v203_v60, 2  ;;  %v661_v16 = vld [vmem:[#allocation5 + $0x3d0] sm:$0xff] }
  0xcc   : > { %2680 = vmatpush1.bf16.msra.mxu0 %v2679_v61  ;;  %1477 = vmatprep.mubr.f32.mxu0 %v3735_v14  ;;  %v434_v61 = vrot.slane %v3743_v20, 2  ;;  %v790_v14 = vld [vmem:[#allocation5 + $0x7d8] sm:$0xff]  ;;  %v787_v49 = vld [vmem:[#allocation5 + $0x7c0] sm:$0xff] }
  0xcd   : > { %2682 = vmatprep.subr.bf16.mxu0 %v2681_v33  ;;  %2552 = vmatpush1.bf16.msra.mxu1 %v2551_v24  ;;  %v3763_v33 = vsel %vm279_vm0, %v316_v29, %v318_v45  ;;  %v321_v24 = vrot.slane %v3743_v20, 1  ;;  %v2689_v31 = vpack.c.bf16 %v790_v14, %v788_v50  ;;  %v794_v29 = vld [vmem:[#allocation5 + $0x7f8] sm:$0xff]  ;;  %v2561_v45 = vpack.c.bf16 %v662_v40, %v660_v52  ;;  %v793_v52 = vld [vmem:[#allocation5 + $0x7f0] sm:$0xff]  ;;  %v796_v40 = vld [vmem:[#allocation5 + $0x808] sm:$0xff] }
  0xce   : > { %964 = vmatmul.mubr.f32.gmra.mrb[24].mxu1 %v3669_v41  ;;  %2554 = vmatprep.subr.bf16.mxu1 %v2553_v23  ;;  %v3768_v23 = vsel %vm392_vm1, %v433_v63, %v434_v61  ;;  %v664_v63 = vld [vmem:[#allocation5 + $0x3e8] sm:$0xff]  ;;  %v323_v14 = vrot.slane %v203_v60, 1  ;;  %v795_v60 = vld [vmem:[#allocation5 + $0x800] sm:$0xff] }
  0xcf   : > { %1478 = vmatmul.mubr.f32.gmra.mrb[24].mxu0 %v3749_v10  ;;  %969 = vmatprep.mubr.f32.mxu1 %v3730_v55  ;;  %4506 = vst [vmem:[#allocation48_spill] sm:$0xff] %v3768_v23  ;;  %v3775_v50 = vsel %vm279_vm0, %v320_v42, %v321_v24 }
  0xd0   : > { %2684 = vmatpush1.bf16.msra.mxu0 %v2683_v37  ;;  %1483 = vmatprep.mubr.f32.mxu0 %v3753_v53  ;;  %v2559_v37 = vpack.c.bf16 %v657_v36, %v655_v58  ;;  %v2693_v58 = vpack.c.bf16 %v794_v29, %v792_v51  ;;  %v791_v36 = vld [vmem:[#allocation5 + $0x7e0] sm:$0xff]  ;;  %v2563_v53 = vpack.c.bf16 %v661_v16, %v659_v11  ;;  %v802_v11 = vld [vmem:[#allocation5 + $0x838] sm:$0xff] }
  0xd1   : > { %2686 = vmatprep.subr.bf16.mxu0 %v2685_v44  ;;  %2556 = vmatpush1.bf16.msra.mxu1 %v2555_v56  ;;  %v666_v44 = vld [vmem:[#allocation5 + $0x3f8] sm:$0xff]  ;;  %v2691_v56 = vpack.c.bf16 %v789_v13, %v787_v49  ;;  %v665_v49 = vld [vmem:[#allocation5 + $0x3f0] sm:$0xff]  ;;  %v3785_v51 = vsel %vm279_vm0, %v321_v24, %v323_v14  ;;  %v804_v14 = vld [vmem:[#allocation5 + $0x848] sm:$0xff] }
  0xd2   : > { %970 = vmatmul.mubr.f32.gmra.mrb[26].mxu1 %v3673_v26  ;;  %2558 = vmatprep.subr.bf16.mxu1 %v2557_v1  ;;  %v3778_v1 = vsel %vm392_vm1, %v434_v61, %v436_v19  ;;  %v2565_v42 = vpack.c.bf16 %v666_v44, %v664_v63  ;;  %v2695_v61 = vpack.c.bf16 %v793_v52, %v791_v36  ;;  %v797_v13 = vld [vmem:[#allocation5 + $0x810] sm:$0xff]  ;;  %v3788_v19 = vld [vmem:[%s3386_s3 + $0xd8] sm:$0xff]  ;;  %v799_v44 = vld [vmem:[#allocation5 + $0x820] sm:$0xff] }
  0xd3   : > { %1484 = vmatmul.mubr.f32.gmra.mrb[26].mxu0 %v3763_v33  ;;  %975 = vmatprep.mubr.f32.mxu1 %v3749_v10  ;;  %v2699_v24 = vpack.c.bf16 %v797_v13, %v795_v60  ;;  %v325_v16 = vrot.slane %v3788_v19, 1  ;;  %v3812_v52 = vld [vmem:[%s3386_s3 + $0xf0] sm:$0xff] }
  0xd4   : > { %2688 = vmatpush1.bf16.msra.mxu0 %v2687_v54  ;;  %1489 = vmatprep.mubr.f32.mxu0 %v3768_v23  ;;  %v798_v54 = vld [vmem:[#allocation5 + $0x818] sm:$0xff]  ;;  %v663_v23 = vld [vmem:[#allocation5 + $0x3e0] sm:$0xff]  ;;  %v330_v60 = vrot.slane %v3812_v52, 1 }
  0xd5   : > { %2690 = vmatprep.subr.bf16.mxu0 %v2689_v31  ;;  %2560 = vmatpush1.bf16.msra.mxu1 %v2559_v37  ;;  %v2697_v31 = vpack.c.bf16 %v798_v54, %v796_v40  ;;  %v3791_v37 = vld [vmem:[%s3386_s3 + $0xe0] sm:$0xff]  ;;  %v2567_v29 = vpack.c.bf16 %v665_v49, %v663_v23  ;;  %v3815_v54 = vld [vmem:[%s3386_s3 + $0xf8] sm:$0xff] }
  0xd6   : > { %976 = vmatmul.mubr.f32.gmra.mrb[28].mxu1 %v3704_v57  ;;  %2562 = vmatprep.subr.bf16.mxu1 %v2561_v45  ;;  %v800_v45 = vld [vmem:[#allocation5 + $0x828] sm:$0xff]  ;;  %v326_v63 = vrot.slane %v3791_v37, 1 }
  0xd7   : > { %1490 = vmatmul.mubr.f32.gmra.mrb[28].mxu0 %v3775_v50  ;;  %981 = vmatprep.mubr.f32.mxu1 %v3763_v33  ;;  %v2701_v23 = vpack.c.bf16 %v802_v11, %v800_v45  ;;  %v808_v49 = vld [vmem:[#allocation5 + $0x868] sm:$0xff]  ;;  %v809_v11 = vld [vmem:[#allocation5 + $0x870] sm:$0xff] }
  0xd8   : > { %2692 = vmatpush1.bf16.msra.mxu0 %v2691_v56  ;;  %1495 = vmatprep.mubr.f32.mxu0 %v3778_v1  ;;  %v801_v56 = vld [vmem:[#allocation5 + $0x830] sm:$0xff] }
  0xd9   : > { %2694 = vmatprep.subr.bf16.mxu0 %v2693_v58  ;;  %2564 = vmatpush1.bf16.msra.mxu1 %v2563_v53  ;;  %v3800_v53 = vld [vmem:[%s3386_s3 + $0xe8] sm:$0x3]  ;;  %v2703_v40 = vpack.c.bf16 %v801_v56, %v799_v44  ;;  %v3841_v56 = vld [vmem:[%s3386_s3 + $0x110] sm:$0xff] }
  0xda   : > { %982 = vmatmul.mubr.f32.gmra.mrb[30].mxu1 %v3708_v18  ;;  %2566 = vmatprep.subr.bf16.mxu1 %v2565_v42  ;;  %v806_v58 = vld [vmem:[#allocation5 + $0x858] sm:$0xff]  ;;  %v328_v36 = vrot.slane %v3800_v53, 1  ;;  %v803_v42 = vld [vmem:[#allocation5 + $0x840] sm:$0xff] }
  0xdb   : > { %1496 = vmatmul.mubr.f32.gmra.mrb[30].mxu0 %v3785_v51  ;;  %987 = vmatprep.mubr.f32.mxu1 %v3775_v50 }
  0xdc   : > { %2696 = vmatpush1.bf16.msra.mxu0 %v2695_v61  ;;  %1662 = vmatprep.mubr.f32.mxu0 %v3575_v34  ;;  %v3808_v34 = vsel %vm279_vm0, %v325_v16, %v326_v63  ;;  %v810_v61 = vld [vmem:[#allocation5 + $0x878] sm:$0xff] }
  0xdd   : > { %2698 = vmatprep.subr.bf16.mxu0 %v2697_v31  ;;  %2568 = vmatpush1.bf16.msra.mxu1 %v2567_v29  ;;  %v331_v31 = vrot.slane %v3815_v54, 1  ;;  %v3827_v29 = vld [vmem:[%s3386_s3 + $0x100] sm:$0x3]  ;;  %v2709_v45 = vpack.c.bf16 %v810_v61, %v808_v49  ;;  %v3853_v49 = vld [vmem:[%s3386_s3 + $0x118] sm:$0x3] }
  0xde   : > { %988 = vmatmul.mubr.f32.gmra.mrb[32].mxu1 %v3739_v4  ;;  %2729 = vmatprep.subr.bf16.mxu1 %v3396_v7  ;;  %v2705_v7 = vpack.c.bf16 %v806_v58, %v804_v14  ;;  %v811_v58 = vld [vmem:[#allocation5 + $0x880] sm:$0xff] }
  0xdf   : > { %1663 = vmatmul.mubr.f32.vlgmr.msra.gmra.mrb[0].mxu0 %v3526_v62  ;;  %993 = vmatprep.mubr.f32.mxu1 %v3785_v51  ;;  %v805_v62 = vld [vmem:[#allocation5 + $0x850] sm:$0xff]  ;;  %v3834_v16 = vsel %vm279_vm0, %v330_v60, %v331_v31 }
  0xe0   : > { %2700 = vmatpush1.bf16.msra.mxu0 %v2699_v24  ;;  %1668 = vmatprep.mubr.f32.mxu0 %v3590_v3  ;;  %v3822_v3 = vsel %vm279_vm0, %v326_v63, %v328_v36  ;;  %v2707_v13 = vpack.c.bf16 %v805_v62, %v803_v42  ;;  %v814_v24 = vld [vmem:[#allocation5 + $0x898] sm:$0xff]  ;;  %v333_v63 = vrot.slane %v3827_v29, 1  ;;  %v816_v36 = vld [vmem:[#allocation5 + $0x8a8] sm:$0xff]  ;;  %v336_v42 = vrot.slane %v3841_v56, 1  ;;  %v817_v60 = vld [vmem:[#allocation5 + $0x8b0] sm:$0xff] }
  0xe1   : > { %2702 = vmatprep.subr.bf16.mxu0 %v2701_v23  ;;  %v3838_v23 = vld [vmem:[%s3386_s3 + $0x108] sm:$0xff] }
  0xe2   : > { %994 = vmatmul.mubr.f32.gmra.mrb[34].mxu1 %v3743_v20 }
  0xe3   : > { %1669 = vmatmul.mubr.f32.gmra.mrb[2].mxu0 %v3529_v0  ;;  %999 = vmatprep.mubr.f32.mxu1 %v3808_v34  ;;  %v807_v0 = vld [vmem:[#allocation5 + $0x860] sm:$0xff] }
  0xe4   : > { %1674 = vmatprep.mubr.f32.mxu0 %v3609_v22  ;;  %2704 = vmatpush1.bf16.msra.mxu0 %v2703_v40  ;;  %v812_v22 = vld [vmem:[#allocation5 + $0x888] sm:$0xff]  ;;  %v2711_v44 = vpack.c.bf16 %v809_v11, %v807_v0  ;;  %v3848_v40 = vsel %vm279_vm0, %v331_v31, %v333_v63  ;;  %v3864_v0 = vld [vmem:[%s3386_s3 + $0x120] sm:$0xff] }
  0xe5   : > { %2706 = vmatprep.subr.bf16.mxu0 %v2705_v7  ;;  %v2713_v14 = vpack.c.bf16 %v814_v24, %v812_v22  ;;  %v335_v7 = vrot.slane %v3838_v23, 1  ;;  %v3867_v22 = vld [vmem:[%s3386_s3 + $0x128] sm:$0xff]  ;;  %v819_v63 = vld [vmem:[#allocation5 + $0x8c0] sm:$0xff] }
  0xe6   : > { %1000 = vmatmul.mubr.f32.gmra.mrb[36].mxu1 %v3788_v19 }
  0xe7   : > { %1675 = vmatmul.mubr.f32.gmra.mrb[4].mxu0 %v3562_v15  ;;  %1005 = vmatprep.mubr.f32.mxu1 %v3822_v3  ;;  %v813_v15 = vld [vmem:[#allocation5 + $0x890] sm:$0xff]  ;;  %v3860_v31 = vsel %vm279_vm0, %v335_v7, %v336_v42 }
  0xe8   : > { %1680 = vmatprep.mubr.f32.mxu0 %v3625_v59  ;;  %2708 = vmatpush1.bf16.msra.mxu0 %v2707_v13  ;;  %v818_v59 = vld [vmem:[#allocation5 + $0x8b8] sm:$0xff]  ;;  %v2715_v62 = vpack.c.bf16 %v813_v15, %v811_v58  ;;  %v340_v58 = vrot.slane %v3864_v0, 1  ;;  %v341_v15 = vrot.slane %v3867_v22, 1 }
  0xe9   : > { %2710 = vmatprep.subr.bf16.mxu0 %v2709_v45  ;;  %v2717_v61 = vpack.c.bf16 %v818_v59, %v816_v36  ;;  %v822_v13 = vld [vmem:[#allocation5 + $0x8d8] sm:$0xff]  ;;  %v338_v45 = vrot.slane %v3853_v49, 1  ;;  %v3879_v59 = vld [vmem:[%s3386_s3 + $0x130] sm:$0x3] }
  0xea   : > { %1006 = vmatmul.mubr.f32.gmra.mrb[38].mxu1 %v3791_v37 }
  0xeb   : > { %1681 = vmatmul.mubr.f32.gmra.mrb[6].mxu0 %v3566_v48  ;;  %1011 = vmatprep.mubr.f32.mxu1 %v3834_v16  ;;  %v815_v48 = vld [vmem:[#allocation5 + $0x8a0] sm:$0xff] }
  0xec   : > { %1686 = vmatprep.mubr.f32.mxu0 %v3644_v28  ;;  %2712 = vmatpush1.bf16.msra.mxu0 %v2711_v44  ;;  %v820_v28 = vld [vmem:[#allocation5 + $0x8c8] sm:$0xff]  ;;  %v2719_v11 = vpack.c.bf16 %v817_v60, %v815_v48  ;;  %v3893_v60 = vld [vmem:[%s3386_s3 + $0x140] sm:$0xff] }
  0xed   : > { %2714 = vmatprep.subr.bf16.mxu0 %v2713_v14  ;;  %v2721_v24 = vpack.c.bf16 %v822_v13, %v820_v28  ;;  %v824_v44 = vld [vmem:[#allocation5 + $0x8e8] sm:$0xff]  ;;  %v3874_v14 = vsel %vm279_vm0, %v336_v42, %v338_v45  ;;  %v343_v42 = vrot.slane %v3879_v59, 1  ;;  %v346_v13 = vrot.slane %v3893_v60, 1 }
  0xee   : > { %1012 = vmatmul.mubr.f32.gmra.mrb[40].mxu1 %v3812_v52  ;;  %v3890_v48 = vld [vmem:[%s3386_s3 + $0x138] sm:$0xff]  ;;  %v3905_v45 = vld [vmem:[%s3386_s3 + $0x148] sm:$0x3] }
  0xef   : > { %1687 = vmatmul.mubr.f32.gmra.mrb[8].mxu0 %v3599_v8  ;;  %1017 = vmatprep.mubr.f32.mxu1 %v3848_v40  ;;  %v821_v8 = vld [vmem:[#allocation5 + $0x8d0] sm:$0xff]  ;;  %v345_v28 = vrot.slane %v3890_v48, 1 }
  0xf0   : > { %1692 = vmatprep.mubr.f32.mxu0 %v3660_v9  ;;  %2716 = vmatpush1.bf16.msra.mxu0 %v2715_v62  ;;  %v826_v9 = vld [vmem:[#allocation5 + $0x8f8] sm:$0xff]  ;;  %v2723_v36 = vpack.c.bf16 %v821_v8, %v819_v63  ;;  %v825_v62 = vld [vmem:[#allocation5 + $0x8f0] sm:$0xff] }
  0xf1   : > { %2718 = vmatprep.subr.bf16.mxu0 %v2717_v61  ;;  %v2725_v7 = vpack.c.bf16 %v826_v9, %v824_v44  ;;  %v3919_v63 = vld [vmem:[%s3386_s3 + $0x158] sm:$0xff]  ;;  %v3931_v9 = vld [vmem:[%s3386_s3 + $0x160] sm:$0x3] }
  0xf2   : > { %1018 = vmatmul.mubr.f32.gmra.mrb[42].mxu1 %v3815_v54  ;;  %v351_v44 = vrot.slane %v3919_v63, 1 }
  0xf3   : > { %1693 = vmatmul.mubr.f32.gmra.mrb[10].mxu0 %v3603_v39  ;;  %1023 = vmatprep.mubr.f32.mxu1 %v3860_v31  ;;  %v823_v39 = vld [vmem:[#allocation5 + $0x8e0] sm:$0xff] }
  0xf4   : > { %1698 = vmatprep.mubr.f32.mxu0 %v3679_v47  ;;  %2720 = vmatpush1.bf16.msra.mxu0 %v2719_v11  ;;  %v3886_v47 = vsel %vm279_vm0, %v340_v58, %v341_v15  ;;  %v2727_v61 = vpack.c.bf16 %v825_v62, %v823_v39  ;;  %v348_v11 = vrot.slane %v3905_v45, 1  ;;  %v353_v58 = vrot.slane %v3931_v9, 1  ;;  %v3957_v62 = vld [vmem:[%s3386_s3 + $0x178] sm:$0x3] }
  0xf5   : > { %2722 = vmatprep.subr.bf16.mxu0 %v2721_v24  ;;  %v3916_v24 = vld [vmem:[%s3386_s3 + $0x150] sm:$0xff] }
  0xf6   : > { %1024 = vmatmul.mubr.f32.gmra.mrb[44].mxu1 %v3838_v23  ;;  %v350_v8 = vrot.slane %v3916_v24, 1 }
  0xf7   : > { %1699 = vmatmul.mubr.f32.gmra.mrb[12].mxu0 %v3634_v6  ;;  %1029 = vmatprep.mubr.f32.mxu1 %v3874_v14 }
  0xf8   : > { %1704 = vmatprep.mubr.f32.mxu0 %v3695_v35  ;;  %2724 = vmatpush1.bf16.msra.mxu0 %v2723_v36  ;;  %v3900_v35 = vsel %vm279_vm0, %v341_v15, %v343_v42  ;;  %v3942_v15 = vld [vmem:[%s3386_s3 + $0x168] sm:$0xff]  ;;  %v3945_v36 = vld [vmem:[%s3386_s3 + $0x170] sm:$0xff]  ;;  %v358_v42 = vrot.slane %v3957_v62, 1 }
  0xf9   : > { %2726 = vmatprep.subr.bf16.mxu0 %v2725_v7  ;;  %v3952_v7 = vsel %vm279_vm0, %v351_v44, %v353_v58  ;;  %v356_v39 = vrot.slane %v3945_v36, 1  ;;  %v3089_v58 = vld [vmem:[%s3386_s3 + $0x68] sm:$0xff] }
  0xfa   : > { %1030 = vmatmul.mubr.f32.gmra.mrb[46].mxu1 %v3841_v56 }
  0xfb   : > { %1705 = vmatmul.mubr.f32.gmra.mrb[14].mxu0 %v3638_v5  ;;  %1035 = vmatprep.mubr.f32.mxu1 %v3886_v47 }
  0xfc   : > { %1710 = vmatprep.mubr.f32.mxu0 %v3714_v27  ;;  %2728 = vmatpush1.bf16.msra.mxu0 %v2727_v61  ;;  %v3912_v27 = vsel %vm279_vm0, %v345_v28, %v346_v13  ;;  %v3972_v61 = vsel %vm279_vm0, %v356_v39, %v358_v42  ;;  %v3083_v28 = vld [vmem:[%s3386_s3 + $0x20] sm:$0xff] }
  0xfd   : > { %v4518_v42 = vld [vmem:[#allocation39_spill] sm:$0xff] }
  0xfe   : > { %1036 = vmatmul.mubr.f32.gmra.mrb[48].mxu1 %v3864_v0 }
  0xff   : > { %1711 = vmatmul.mubr.f32.gmra.mrb[16].mxu0 %v3669_v41  ;;  %1041 = vmatprep.mubr.f32.mxu1 %v3900_v35 }
 0x100   : > { %1716 = vmatprep.mubr.f32.mxu0 %v3730_v55  ;;  %v3926_v55 = vsel %vm279_vm0, %v346_v13, %v348_v11  ;;  %v3084_v13 = vld [vmem:[%s3386_s3 + $0x30] sm:$0xff] }
 0x101   : > { %v4513_v11 = vld [vmem:[#allocation15_spill] sm:$0xff] }
 0x102   : > { %1042 = vmatmul.mubr.f32.gmra.mrb[50].mxu1 %v3867_v22 }
 0x103   : > { %1717 = vmatmul.mubr.f32.gmra.mrb[18].mxu0 %v3673_v26  ;;  %1047 = vmatprep.mubr.f32.mxu1 %v3912_v27 }
 0x104   : > { %1722 = vmatprep.mubr.f32.mxu0 %v3749_v10  ;;  %v3938_v10 = vsel %vm279_vm0, %v350_v8, %v351_v44  ;;  %v4514_v8 = vld [vmem:[#allocation16_spill] sm:$0xff]  ;;  %v4515_v44 = vld [vmem:[#allocation38_spill] sm:$0xff] }
 0x106   : > { %1048 = vmatmul.mubr.f32.gmra.mrb[52].mxu1 %v3890_v48 }
 0x107   : > { %1723 = vmatmul.mubr.f32.gmra.mrb[20].mxu0 %v3704_v57  ;;  %1053 = vmatprep.mubr.f32.mxu1 %v3926_v55 }
 0x108   : > { %1728 = vmatprep.mubr.f32.mxu0 %v3763_v33  ;;  %v355_v33 = vrot.slane %v3942_v15, 1 }
 0x10a   : > { %1054 = vmatmul.mubr.f32.gmra.mrb[54].mxu1 %v3893_v60 }
 0x10b   : > { %1729 = vmatmul.mubr.f32.gmra.mrb[22].mxu0 %v3708_v18  ;;  %1059 = vmatprep.mubr.f32.mxu1 %v3938_v10 }
 0x10c   : > { %1734 = vmatprep.mubr.f32.mxu0 %v3775_v50  ;;  %v3964_v50 = vsel %vm279_vm0, %v355_v33, %v356_v39  ;;  %v4516_v33 = vld [vmem:[#allocation17_spill] sm:$0xff]  ;;  %v4517_v39 = vld [vmem:[#allocation18_spill] sm:$0xff] }
 0x10e   : > { %1060 = vmatmul.mubr.f32.gmra.mrb[56].mxu1 %v3916_v24 }
 0x10f   : > { %1735 = vmatmul.mubr.f32.gmra.mrb[24].mxu0 %v3739_v4  ;;  %1065 = vmatprep.mubr.f32.mxu1 %v3952_v7 }
 0x110   : > { %1740 = vmatprep.mubr.f32.mxu0 %v3785_v51  ;;  %v3082_v51 = vld [vmem:[%s3386_s3 + $0x18] sm:$0xff] }
 0x112   : > { %1066 = vmatmul.mubr.f32.gmra.mrb[58].mxu1 %v3919_v63 }
 0x113   : > { %1741 = vmatmul.mubr.f32.gmra.mrb[26].mxu0 %v3743_v20  ;;  %1071 = vmatprep.mubr.f32.mxu1 %v3964_v50 }
 0x114   : > { %1746 = vmatprep.mubr.f32.mxu0 %v3808_v34 }
 0x116   : > { %1072 = vmatmul.mubr.f32.gmra.mrb[60].mxu1 %v3942_v15 }
 0x117   : > { %1747 = vmatmul.mubr.f32.gmra.mrb[28].mxu0 %v3788_v19  ;;  %1077 = vmatprep.mubr.f32.mxu1 %v3972_v61 }
 0x118   : > { %1752 = vmatprep.mubr.f32.mxu0 %v3822_v3 }
 0x11a   : > { %1078 = vmatmul.mubr.f32.gmra.mrb[62].mxu1 %v3945_v36 }
 0x11b   : > { %1753 = vmatmul.mubr.f32.gmra.mrb[30].mxu0 %v3791_v37  ;;  %1148 = vmatprep.mubr.f32.mxu1 %v3082_v51  ;;  %v4519_v51 = vld [vmem:[#allocation19_spill] sm:$0xff] }
 0x11c   : > { %1758 = vmatprep.mubr.f32.mxu0 %v3834_v16 }
 0x11e   : > { %1149 = vmatmul.mubr.f32.vlgmr.msra.gmra.mrb[0].mxu1 %v3550_v46  ;;  %v4512_v46 = vld [vmem:[#allocation37_spill] sm:$0xff] }
 0x11f   : > { %1759 = vmatmul.mubr.f32.gmra.mrb[32].mxu0 %v3812_v52  ;;  %2745 = vmatpush1.bf16.msra.mxu1 %v3398_v12  ;;  %v3085_v12 = vld [vmem:[%s3386_s3 + $0x38] sm:$0xff] }
 0x120   : > { %1154 = vmatprep.mubr.f32.mxu1 %v3083_v28  ;;  %1764 = vmatprep.mubr.f32.mxu0 %v3848_v40  ;;  %v4520_v28 = vld [vmem:[#allocation20_spill] sm:$0xff] }
 0x121   : > { %2730 = vmatprep.subr.bf16.mxu1 %v3401_v17  ;;  %v3086_v17 = vld [vmem:[%s3386_s3 + $0x48] sm:$0xff] }
 0x122   : > { %1155 = vmatmul.mubr.f32.gmra.mrb[2].mxu1 %v3571_v32  ;;  %v3088_v32 = vld [vmem:[%s3386_s3 + $0x60] sm:$0xff] }
 0x123   : > { %1765 = vmatmul.mubr.f32.gmra.mrb[34].mxu0 %v3815_v54  ;;  %1160 = vmatprep.mubr.f32.mxu1 %v3084_v13  ;;  %v4521_v13 = vld [vmem:[#allocation40_spill] sm:$0xff] }
 0x124   : > { %1770 = vmatprep.mubr.f32.mxu0 %v3860_v31  ;;  %2746 = vmatpush1.bf16.msra.mxu1 %v3405_v25  ;;  %v4507_v25 = vld [vmem:[#allocation11_spill] sm:$0xff] }
 0x125   : > { %2731 = vmatprep.subr.bf16.mxu1 %v3407_v30  ;;  %v4508_v30 = vld [vmem:[#allocation12_spill] sm:$0xff] }
 0x126   : > { %1161 = vmatmul.mubr.f32.gmra.mrb[4].mxu1 %v3491_v2  ;;  %v4509_v2 = vld [vmem:[#allocation36_spill] sm:$0xff] }
 0x127   : > { %1771 = vmatmul.mubr.f32.gmra.mrb[36].mxu0 %v3838_v23  ;;  %1166 = vmatprep.mubr.f32.mxu1 %v3085_v12  ;;  %v4522_v12 = vld [vmem:[#allocation21_spill] sm:$0xff] }
 0x128   : > { %1776 = vmatprep.mubr.f32.mxu0 %v3874_v14  ;;  %2747 = vmatpush1.bf16.msra.mxu1 %v3410_v38  ;;  %v3087_v38 = vld [vmem:[%s3386_s3 + $0x50] sm:$0xff] }
 0x129   : > { %2732 = vmatprep.subr.bf16.mxu1 %v3413_v43  ;;  %v4510_v43 = vld [vmem:[#allocation13_spill] sm:$0xff] }
 0x12a   : > { %1167 = vmatmul.mubr.f32.gmra.mrb[6].mxu1 %v3542_v21  ;;  %v4511_v21 = vld [vmem:[#allocation14_spill] sm:$0xff] }
 0x12b   : > { %1777 = vmatmul.mubr.f32.gmra.mrb[38].mxu0 %v3841_v56  ;;  %1172 = vmatprep.mubr.f32.mxu1 %v3086_v17  ;;  %v4523_v17 = vld [vmem:[#allocation22_spill] sm:$0xff] }
 0x12c   : > { %1782 = vmatprep.mubr.f32.mxu0 %v3886_v47  ;;  %2748 = vmatpush1.bf16.msra.mxu1 %v4507_v25  ;;  %v4038_v25 = vld [vmem:[%s3386_s3 + $0x180] sm:$0xff] }
 0x12d   : > { %2733 = vmatprep.subr.bf16.mxu1 %v4508_v30  ;;  %v4041_v30 = vld [vmem:[%s3386_s3 + $0x188] sm:$0xff] }
 0x12e   : > { %1173 = vmatmul.mubr.f32.gmra.mrb[8].mxu1 %v4509_v2 }
 0x12f   : > { %1783 = vmatmul.mubr.f32.gmra.mrb[40].mxu0 %v3864_v0  ;;  %1178 = vmatprep.mubr.f32.mxu1 %v3087_v38  ;;  %v508_v38 = vrot.slane %v4038_v25, 1 }
 0x130   : > { %1788 = vmatprep.mubr.f32.mxu0 %v3900_v35  ;;  %2749 = vmatpush1.bf16.msra.mxu1 %v4510_v43  ;;  %v509_v43 = vrot.slane %v4041_v30, 1 }
 0x131   : > { %2734 = vmatprep.subr.bf16.mxu1 %v4511_v21  ;;  %v4526_v21 = vld [vmem:[#allocation24_spill] sm:$0xff] }
 0x132   : > { %1179 = vmatmul.mubr.f32.gmra.mrb[10].mxu1 %v4512_v46 }
 0x133   : > { %1789 = vmatmul.mubr.f32.gmra.mrb[42].mxu0 %v3867_v22  ;;  %1184 = vmatprep.mubr.f32.mxu1 %v3088_v32  ;;  %v4527_v32 = vld [vmem:[#allocation42_spill] sm:$0xff] }
 0x134   : > { %1794 = vmatprep.mubr.f32.mxu0 %v3912_v27  ;;  %2750 = vmatpush1.bf16.msra.mxu1 %v4513_v11  ;;  %v4052_v11 = vld [vmem:[%s3386_s3 + $0x190] sm:$0x3] }
 0x135   : > { %2735 = vmatprep.subr.bf16.mxu1 %v4514_v8  ;;  %v4059_v8 = vsel %vm279_vm0, %v508_v38, %v509_v43  ;;  %v4534_v38 = vld [vmem:[#allocation28_spill] sm:$0xff] }
 0x136   : > { %1185 = vmatmul.mubr.f32.gmra.mrb[12].mxu1 %v4515_v44  ;;  %4529 = vst [vmem:[#allocation11_spill] sm:$0xff] %v4059_v8 }
 0x137   : > { %1795 = vmatmul.mubr.f32.gmra.mrb[44].mxu0 %v3890_v48  ;;  %1190 = vmatprep.mubr.f32.mxu1 %v3089_v58  ;;  %v511_v58 = vrot.slane %v4052_v11, 1 }
 0x138   : > { %1800 = vmatprep.mubr.f32.mxu0 %v3926_v55  ;;  %2751 = vmatpush1.bf16.msra.mxu1 %v4516_v33  ;;  %v4530_v33 = vld [vmem:[#allocation26_spill] sm:$0xff] }
 0x139   : > { %2736 = vmatprep.subr.bf16.mxu1 %v4517_v39  ;;  %v4531_v39 = vld [vmem:[#allocation43_spill] sm:$0xff] }
 0x13a   : > { %1191 = vmatmul.mubr.f32.gmra.mrb[14].mxu1 %v4518_v42 }
 0x13b   : > { %1801 = vmatmul.mubr.f32.gmra.mrb[46].mxu0 %v3893_v60  ;;  %1196 = vmatprep.mubr.f32.mxu1 %v3634_v6  ;;  %v4524_v6 = vld [vmem:[#allocation41_spill] sm:$0xff] }
 0x13c   : > { %1806 = vmatprep.mubr.f32.mxu0 %v3938_v10  ;;  %2752 = vmatpush1.bf16.msra.mxu1 %v4519_v51  ;;  %v4065_v51 = vld [vmem:[%s3386_s3 + $0x198] sm:$0xff] }
 0x13d   : > { %2737 = vmatprep.subr.bf16.mxu1 %v4520_v28  ;;  %v4068_v28 = vld [vmem:[%s3386_s3 + $0x1a0] sm:$0xff] }
 0x13e   : > { %1197 = vmatmul.mubr.f32.gmra.mrb[16].mxu1 %v4521_v13 }
 0x13f   : > { %1807 = vmatmul.mubr.f32.gmra.mrb[48].mxu0 %v3916_v24  ;;  %1202 = vmatprep.mubr.f32.mxu1 %v3638_v5  ;;  %v4525_v5 = vld [vmem:[#allocation23_spill] sm:$0xff] }
 0x140   : > { %1812 = vmatprep.mubr.f32.mxu0 %v3952_v7  ;;  %2753 = vmatpush1.bf16.msra.mxu1 %v4522_v12  ;;  %v4075_v12 = vsel %vm279_vm0, %v509_v43, %v511_v58 }
 0x141   : > { %2738 = vmatprep.subr.bf16.mxu1 %v4523_v17  ;;  %4533 = vst [vmem:[#allocation12_spill] sm:$0xff] %v4075_v12  ;;  %v525_v17 = vrot.slane %v4065_v51, 1 }
 0x142   : > { %1203 = vmatmul.mubr.f32.gmra.mrb[18].mxu1 %v4524_v6 }
 0x143   : > { %1813 = vmatmul.mubr.f32.gmra.mrb[50].mxu0 %v3919_v63  ;;  %1208 = vmatprep.mubr.f32.mxu1 %v3669_v41  ;;  %v4528_v41 = vld [vmem:[#allocation25_spill] sm:$0xff] }
 0x144   : > { %1818 = vmatprep.mubr.f32.mxu0 %v3964_v50  ;;  %2754 = vmatpush1.bf16.msra.mxu1 %v4525_v5  ;;  %v526_v5 = vrot.slane %v4068_v28, 1 }
 0x145   : > { %2739 = vmatprep.subr.bf16.mxu1 %v4526_v21  ;;  %v4535_v21 = vld [vmem:[#allocation44_spill] sm:$0xff] }
 0x146   : > { %1209 = vmatmul.mubr.f32.gmra.mrb[20].mxu1 %v4527_v32  ;;  %v527_v43 = vsel %vm279_vm0, %v525_v17, %v526_v5  ;;  %v4542_v17 = vld [vmem:[#allocation33_spill] sm:$0xff] }
 0x147   : > { %1819 = vmatmul.mubr.f32.gmra.mrb[52].mxu0 %v3942_v15  ;;  %1214 = vmatprep.mubr.f32.mxu1 %v3673_v26  ;;  %v4532_v26 = vld [vmem:[#allocation27_spill] sm:$0xff] }
 0x148   : > { %1824 = vmatprep.mubr.f32.mxu0 %v3972_v61  ;;  %2755 = vmatpush1.bf16.msra.mxu1 %v4528_v41  ;;  %v4082_v41 = vld [vmem:[%s3386_s3 + $0x1a8] sm:$0x3] }
 0x149   : > { %2740 = vmatprep.subr.bf16.mxu1 %v4530_v33  ;;  %v528_v58 = vrot.slane %v4082_v41, 1  ;;  %v4537_v33 = vld [vmem:[#allocation30_spill] sm:$0xff] }
 0x14a   : > { %1215 = vmatmul.mubr.f32.gmra.mrb[22].mxu1 %v4531_v39 }
 0x14b   : > { %1825 = vmatmul.mubr.f32.gmra.mrb[54].mxu0 %v3945_v36  ;;  %1220 = vmatprep.mubr.f32.mxu1 %v3704_v57  ;;  %v4536_v57 = vld [vmem:[#allocation29_spill] sm:$0xff] }
 0x14c   : > { %1830 = vmatprep.mubr.f32.mxu0 %v4059_v8  ;;  %2756 = vmatpush1.bf16.msra.mxu1 %v4532_v26  ;;  %v4538_v26 = vld [vmem:[#allocation45_spill] sm:$0xff]  ;;  %v4544_v8 = vld [vmem:[#allocation47_spill] sm:$0xff] }
 0x14d   : > { %2741 = vmatprep.subr.bf16.mxu1 %v4534_v38  ;;  %v4539_v38 = vld [vmem:[#allocation31_spill] sm:$0xff] }
 0x14e   : > { %1221 = vmatmul.mubr.f32.gmra.mrb[24].mxu1 %v4535_v21 }
 0x14f   : > { %1831 = vmatmul.mubr.f32.gmra.mrb[56].mxu0 %v4038_v25  ;;  %1226 = vmatprep.mubr.f32.mxu1 %v3708_v18  ;;  %v529_v18 = vsel %vm279_vm0, %v526_v5, %v528_v58  ;;  %v4546_v5 = vld [vmem:[#allocation48_spill] sm:$0xff] }
 0x150   : > { %1836 = vmatprep.mubr.f32.mxu0 %v4075_v12  ;;  %2757 = vmatpush1.bf16.msra.mxu1 %v4536_v57  ;;  %v4540_v12 = vld [vmem:[#allocation32_spill] sm:$0xff]  ;;  %v4541_v57 = vld [vmem:[#allocation46_spill] sm:$0xff] }
 0x151   : > { %2742 = vmatprep.subr.bf16.mxu1 %v4537_v33  ;;  %v4543_v33 = vld [vmem:[#allocation34_spill] sm:$0xff] }
 0x152   : > { %1227 = vmatmul.mubr.f32.gmra.mrb[26].mxu1 %v4538_v26 }
 0x153   : > { %1837 = vmatmul.mubr.f32.gmra.mrb[58].mxu0 %v4041_v30  ;;  %1232 = vmatprep.mubr.f32.mxu1 %v3739_v4  ;;  %v3226_v4 = vmov 0.0  }
 0x154   : > { %1842 = vmatprep.mubr.f32.mxu0 %v527_v43  ;;  %2758 = vmatpush1.bf16.msra.mxu1 %v4539_v38  ;;  %v439_v43 = vrot.slane %v3791_v37, 2  ;;  %v441_v38 = vrot.slane %v3800_v53, 2 }
 0x155   : > { %2743 = vmatprep.subr.bf16.mxu1 %v4540_v12  ;;  %v4545_v12 = vld [vmem:[#allocation35_spill] sm:$0xff] }
 0x156   : > { %1233 = vmatmul.mubr.f32.gmra.mrb[28].mxu1 %v4541_v57 }
 0x157   : > { %1843 = vmatmul.mubr.f32.gmra.mrb[60].mxu0 %v4065_v51  ;;  %1238 = vmatprep.mubr.f32.mxu1 %v3743_v20  ;;  %v438_v20 = vrot.slane %v3788_v19, 2 }
 0x158   : > { %1848 = vmatprep.mubr.f32.mxu0 %v529_v18  ;;  %2759 = vmatpush1.bf16.msra.mxu1 %v4542_v17  ;;  %v469_v18 = vrot.slane %v3945_v36, 2 }
 0x159   : > { %2744 = vmatprep.subr.bf16.mxu1 %v4543_v33  ;;  %v4117_v58 = vsel %vm392_vm1, %v438_v20, %v439_v43 }
 0x15a   : > { %1239 = vmatmul.mubr.f32.gmra.mrb[30].mxu1 %v4544_v8 }
 0x15b   : > { %1849 = vmatmul.mubr.f32.gmra.mrb[62].mxu0 %v4068_v28  ;;  %1244 = vmatprep.mubr.f32.mxu1 %v3788_v19  ;;  %v4125_v19 = vsel %vm392_vm1, %v439_v43, %v441_v38 }
 0x15c   : > { %1919 = vmatprep.mubr.f32.mxu0 %v3226_v4  ;;  %2760 = vmatpush1.bf16.msra.mxu1 %v4545_v12 }
 0x15e   : > { %1245 = vmatmul.mubr.f32.gmra.mrb[32].mxu1 %v4546_v5 }
 0x15f   : > { %1920 = vmatmul.mubr.f32.vlgmr.msra.gmra.mrb[0].mxu0 %v4509_v2  ;;  %1250 = vmatprep.mubr.f32.mxu1 %v3791_v37  ;;  %v443_v37 = vrot.slane %v3812_v52, 2  ;;  %v444_v2 = vrot.slane %v3815_v54, 2 }
 0x160   : > { %1925 = vmatprep.mubr.f32.mxu0 %v3226_v4 }
 0x161   : > { %v4134_v53 = vsel %vm392_vm1, %v443_v37, %v444_v2 }
 0x162   : > { %1251 = vmatmul.mubr.f32.gmra.mrb[34].mxu1 %v3778_v1 }
 0x163   : > { %1926 = vmatmul.mubr.f32.gmra.mrb[2].mxu0 %v4512_v46  ;;  %1256 = vmatprep.mubr.f32.mxu1 %v3812_v52  ;;  %v446_v46 = vrot.slane %v3827_v29, 2 }
 0x164   : > { %1931 = vmatprep.mubr.f32.mxu0 %v3226_v4 }
 0x165   : > { %v4142_v52 = vsel %vm392_vm1, %v444_v2, %v446_v46 }
 0x166   : > { %1257 = vmatmul.mubr.f32.gmra.mrb[36].mxu1 %v4117_v58 }
 0x167   : > { %1932 = vmatmul.mubr.f32.gmra.mrb[4].mxu0 %v4515_v44  ;;  %1262 = vmatprep.mubr.f32.mxu1 %v3815_v54  ;;  %v448_v54 = vrot.slane %v3838_v23, 2  ;;  %v449_v44 = vrot.slane %v3841_v56, 2 }
 0x168   : > { %1937 = vmatprep.mubr.f32.mxu0 %v3226_v4 }
 0x169   : > { %v4151_v29 = vsel %vm392_vm1, %v448_v54, %v449_v44 }
 0x16a   : > { %1263 = vmatmul.mubr.f32.gmra.mrb[38].mxu1 %v4125_v19 }
 0x16b   : > { %1938 = vmatmul.mubr.f32.gmra.mrb[6].mxu0 %v4518_v42  ;;  %1268 = vmatprep.mubr.f32.mxu1 %v3838_v23  ;;  %v451_v42 = vrot.slane %v3853_v49, 2 }
 0x16c   : > { %1943 = vmatprep.mubr.f32.mxu0 %v3226_v4 }
 0x16d   : > { %v4159_v23 = vsel %vm392_vm1, %v449_v44, %v451_v42 }
 0x16e   : > { %1269 = vmatmul.mubr.f32.gmra.mrb[40].mxu1 %v4134_v53 }
 0x16f   : > { %1944 = vmatmul.mubr.f32.gmra.mrb[8].mxu0 %v4521_v13  ;;  %1274 = vmatprep.mubr.f32.mxu1 %v3841_v56  ;;  %v453_v56 = vrot.slane %v3864_v0, 2  ;;  %v454_v13 = vrot.slane %v3867_v22, 2 }
 0x170   : > { %1949 = vmatprep.mubr.f32.mxu0 %v3226_v4 }
 0x171   : > { %v4168_v49 = vsel %vm392_vm1, %v453_v56, %v454_v13 }
 0x172   : > { %1275 = vmatmul.mubr.f32.gmra.mrb[42].mxu1 %v4142_v52 }
 0x173   : > { %1950 = vmatmul.mubr.f32.gmra.mrb[10].mxu0 %v4524_v6  ;;  %1280 = vmatprep.mubr.f32.mxu1 %v3864_v0  ;;  %v456_v6 = vrot.slane %v3879_v59, 2 }
 0x174   : > { %1955 = vmatprep.mubr.f32.mxu0 %v3226_v4 }
 0x175   : > { %v4176_v0 = vsel %vm392_vm1, %v454_v13, %v456_v6 }
 0x176   : > { %1281 = vmatmul.mubr.f32.gmra.mrb[44].mxu1 %v4151_v29 }
 0x177   : > { %1956 = vmatmul.mubr.f32.gmra.mrb[12].mxu0 %v4527_v32  ;;  %1286 = vmatprep.mubr.f32.mxu1 %v3867_v22  ;;  %v458_v22 = vrot.slane %v3890_v48, 2  ;;  %v459_v32 = vrot.slane %v3893_v60, 2 }
 0x178   : > { %1961 = vmatprep.mubr.f32.mxu0 %v3226_v4 }
 0x179   : > { %v4185_v59 = vsel %vm392_vm1, %v458_v22, %v459_v32 }
 0x17a   : > { %1287 = vmatmul.mubr.f32.gmra.mrb[46].mxu1 %v4159_v23 }
 0x17b   : > { %1962 = vmatmul.mubr.f32.gmra.mrb[14].mxu0 %v4531_v39  ;;  %1292 = vmatprep.mubr.f32.mxu1 %v3890_v48  ;;  %v461_v39 = vrot.slane %v3905_v45, 2 }
 0x17c   : > { %1967 = vmatprep.mubr.f32.mxu0 %v3226_v4 }
 0x17d   : > { %v4193_v48 = vsel %vm392_vm1, %v459_v32, %v461_v39 }
 0x17e   : > { %1293 = vmatmul.mubr.f32.gmra.mrb[48].mxu1 %v4168_v49 }
 0x17f   : > { %1968 = vmatmul.mubr.f32.gmra.mrb[16].mxu0 %v4535_v21  ;;  %1298 = vmatprep.mubr.f32.mxu1 %v3893_v60  ;;  %v463_v60 = vrot.slane %v3916_v24, 2  ;;  %v464_v21 = vrot.slane %v3919_v63, 2 }
 0x180   : > { %1973 = vmatprep.mubr.f32.mxu0 %v3226_v4 }
 0x181   : > { %v465_v45 = vsel %vm392_vm1, %v463_v60, %v464_v21 }
 0x182   : > { %1299 = vmatmul.mubr.f32.gmra.mrb[50].mxu1 %v4176_v0 }
 0x183   : > { %1974 = vmatmul.mubr.f32.gmra.mrb[18].mxu0 %v4538_v26  ;;  %1304 = vmatprep.mubr.f32.mxu1 %v3916_v24  ;;  %v466_v26 = vrot.slane %v3931_v9, 2 }
 0x184   : > { %1979 = vmatprep.mubr.f32.mxu0 %v3226_v4 }
 0x185   : > { %v467_v24 = vsel %vm392_vm1, %v464_v21, %v466_v26 }
 0x186   : > { %1305 = vmatmul.mubr.f32.gmra.mrb[52].mxu1 %v4185_v59 }
 0x187   : > { %1980 = vmatmul.mubr.f32.gmra.mrb[20].mxu0 %v4541_v57  ;;  %1310 = vmatprep.mubr.f32.mxu1 %v3919_v63  ;;  %v468_v63 = vrot.slane %v3942_v15, 2 }
 0x188   : > { %1985 = vmatprep.mubr.f32.mxu0 %v3226_v4 }
 0x189   : > { %v470_v9 = vsel %vm392_vm1, %v468_v63, %v469_v18 }
 0x18a   : > { %1311 = vmatmul.mubr.f32.gmra.mrb[54].mxu1 %v4193_v48 }
 0x18b   : > { %1986 = vmatmul.mubr.f32.gmra.mrb[22].mxu0 %v4544_v8  ;;  %1316 = vmatprep.mubr.f32.mxu1 %v3942_v15  ;;  %v471_v8 = vrot.slane %v3957_v62, 2 }
 0x18c   : > { %1991 = vmatprep.mubr.f32.mxu0 %v3226_v4 }
 0x18d   : > { %v472_v15 = vsel %vm392_vm1, %v469_v18, %v471_v8 }
 0x18e   : > { %1317 = vmatmul.mubr.f32.gmra.mrb[56].mxu1 %v465_v45 }
 0x18f   : > { %1992 = vmatmul.mubr.f32.gmra.mrb[24].mxu0 %v4546_v5  ;;  %1322 = vmatprep.mubr.f32.mxu1 %v3945_v36 }
 0x190   : > { %1997 = vmatprep.mubr.f32.mxu0 %v3226_v4 }
 0x192   : > { %1323 = vmatmul.mubr.f32.gmra.mrb[58].mxu1 %v467_v24 }
 0x193   : > { %1998 = vmatmul.mubr.f32.gmra.mrb[26].mxu0 %v3778_v1  ;;  %1328 = vmatprep.mubr.f32.mxu1 %v4038_v25  ;;  %v515_v1 = vrot.slane %v4038_v25, 2 }
 0x194   : > { %2003 = vmatprep.mubr.f32.mxu0 %v3226_v4 }
 0x196   : > { %1329 = vmatmul.mubr.f32.gmra.mrb[60].mxu1 %v470_v9 }
 0x197   : > { %2004 = vmatmul.mubr.f32.gmra.mrb[28].mxu0 %v4117_v58  ;;  %1334 = vmatprep.mubr.f32.mxu1 %v4041_v30 }
 0x198   : > { %2009 = vmatprep.mubr.f32.mxu0 %v3226_v4 }
 0x19a   : > { %1335 = vmatmul.mubr.f32.gmra.mrb[62].mxu1 %v472_v15 }
 0x19b   : > { %2010 = vmatmul.mubr.f32.gmra.mrb[30].mxu0 %v4125_v19  ;;  %1501 = vmatprep.mubr.f32.mxu1 %v4117_v58 }
 0x19c   : > { %2015 = vmatprep.mubr.f32.mxu0 %v3226_v4 }
 0x19e   : > { %1502 = vmatmul.mubr.f32.vlgmr.msra.gmra.mrb[32].mxu1 %v3808_v34  ;;  %v516_v34 = vrot.slane %v4041_v30, 2 }
 0x19f   : > { %2016 = vmatmul.mubr.f32.gmra.mrb[32].mxu0 %v4134_v53  ;;  %1507 = vmatprep.mubr.f32.mxu1 %v4125_v19 }
 0x1a0   : > { %2021 = vmatprep.mubr.f32.mxu0 %v3226_v4 }
 0x1a2   : > { %1508 = vmatmul.mubr.f32.gmra.mrb[34].mxu1 %v3822_v3  ;;  %v517_v3 = vsel %vm392_vm1, %v515_v1, %v516_v34 }
 0x1a3   : > { %2022 = vmatmul.mubr.f32.gmra.mrb[34].mxu0 %v4142_v52  ;;  %1513 = vmatprep.mubr.f32.mxu1 %v4134_v53 }
 0x1a4   : > { %2027 = vmatprep.mubr.f32.mxu0 %v3226_v4 }
 0x1a6   : > { %1514 = vmatmul.mubr.f32.gmra.mrb[36].mxu1 %v3834_v16  ;;  %v518_v16 = vrot.slane %v4052_v11, 2 }
 0x1a7   : > { %2028 = vmatmul.mubr.f32.gmra.mrb[36].mxu0 %v4151_v29  ;;  %1519 = vmatprep.mubr.f32.mxu1 %v4142_v52 }
 0x1a8   : > { %2033 = vmatprep.mubr.f32.mxu0 %v3226_v4 }
 0x1aa   : > { %1520 = vmatmul.mubr.f32.gmra.mrb[38].mxu1 %v3848_v40  ;;  %v519_v40 = vsel %vm392_vm1, %v516_v34, %v518_v16 }
 0x1ab   : > { %2034 = vmatmul.mubr.f32.gmra.mrb[38].mxu0 %v4159_v23  ;;  %1525 = vmatprep.mubr.f32.mxu1 %v4151_v29 }
 0x1ac   : > { %2039 = vmatprep.mubr.f32.mxu0 %v3226_v4 }
 0x1ae   : > { %1526 = vmatmul.mubr.f32.gmra.mrb[40].mxu1 %v3860_v31  ;;  %v532_v31 = vrot.slane %v4065_v51, 2 }
 0x1af   : > { %2040 = vmatmul.mubr.f32.gmra.mrb[40].mxu0 %v4168_v49  ;;  %1531 = vmatprep.mubr.f32.mxu1 %v4159_v23 }
 0x1b0   : > { %2045 = vmatprep.mubr.f32.mxu0 %v3226_v4 }
 0x1b2   : > { %1532 = vmatmul.mubr.f32.gmra.mrb[42].mxu1 %v3874_v14  ;;  %v533_v14 = vrot.slane %v4068_v28, 2 }
 0x1b3   : > { %2046 = vmatmul.mubr.f32.gmra.mrb[42].mxu0 %v4176_v0  ;;  %1537 = vmatprep.mubr.f32.mxu1 %v4168_v49 }
 0x1b4   : > { %2051 = vmatprep.mubr.f32.mxu0 %v3226_v4 }
 0x1b6   : > { %1538 = vmatmul.mubr.f32.gmra.mrb[44].mxu1 %v3886_v47  ;;  %v534_v47 = vsel %vm392_vm1, %v532_v31, %v533_v14 }
 0x1b7   : > { %2052 = vmatmul.mubr.f32.gmra.mrb[44].mxu0 %v4185_v59  ;;  %1543 = vmatprep.mubr.f32.mxu1 %v4176_v0 }
 0x1b8   : > { %2057 = vmatprep.mubr.f32.mxu0 %v3226_v4 }
 0x1ba   : > { %1544 = vmatmul.mubr.f32.gmra.mrb[46].mxu1 %v3900_v35  ;;  %v535_v35 = vrot.slane %v4082_v41, 2 }
 0x1bb   : > { %2058 = vmatmul.mubr.f32.gmra.mrb[46].mxu0 %v4193_v48  ;;  %1549 = vmatprep.mubr.f32.mxu1 %v4185_v59 }
 0x1bc   : > { %2063 = vmatprep.mubr.f32.mxu0 %v3226_v4 }
 0x1be   : > { %1550 = vmatmul.mubr.f32.gmra.mrb[48].mxu1 %v3912_v27  ;;  %v4547_v27 = vld [vmem:[#allocation11_spill] sm:$0xff] }
 0x1bf   : > { %2064 = vmatmul.mubr.f32.gmra.mrb[48].mxu0 %v465_v45  ;;  %1555 = vmatprep.mubr.f32.mxu1 %v4193_v48 }
 0x1c0   : > { %2069 = vmatprep.mubr.f32.mxu0 %v3226_v4 }
 0x1c2   : > { %1556 = vmatmul.mubr.f32.gmra.mrb[50].mxu1 %v3926_v55  ;;  %v536_v55 = vsel %vm392_vm1, %v533_v14, %v535_v35 }
 0x1c3   : > { %2070 = vmatmul.mubr.f32.gmra.mrb[50].mxu0 %v467_v24  ;;  %1561 = vmatprep.mubr.f32.mxu1 %v465_v45 }
 0x1c4   : > { %2075 = vmatprep.mubr.f32.mxu0 %v3226_v4 }
 0x1c6   : > { %1562 = vmatmul.mubr.f32.gmra.mrb[52].mxu1 %v3938_v10  ;;  %v4548_v10 = vld [vmem:[#allocation12_spill] sm:$0xff] }
 0x1c7   : > { %2076 = vmatmul.mubr.f32.gmra.mrb[52].mxu0 %v470_v9  ;;  %1567 = vmatprep.mubr.f32.mxu1 %v467_v24 }
 0x1c8   : > { %2081 = vmatprep.mubr.f32.mxu0 %v3226_v4 }
 0x1ca   : > { %1568 = vmatmul.mubr.f32.gmra.mrb[54].mxu1 %v3952_v7 }
 0x1cb   : > { %2082 = vmatmul.mubr.f32.gmra.mrb[54].mxu0 %v472_v15  ;;  %1573 = vmatprep.mubr.f32.mxu1 %v470_v9 }
 0x1cc   : > { %2087 = vmatprep.mubr.f32.mxu0 %v3226_v4 }
 0x1ce   : > { %1574 = vmatmul.mubr.f32.gmra.mrb[56].mxu1 %v3964_v50 }
 0x1cf   : > { %2088 = vmatmul.mubr.f32.gmra.mrb[56].mxu0 %v517_v3  ;;  %1579 = vmatprep.mubr.f32.mxu1 %v472_v15 }
 0x1d0   : > { %2093 = vmatprep.mubr.f32.mxu0 %v3226_v4 }
 0x1d2   : > { %1580 = vmatmul.mubr.f32.gmra.mrb[58].mxu1 %v3972_v61 }
 0x1d3   : > { %2094 = vmatmul.mubr.f32.gmra.mrb[58].mxu0 %v519_v40  ;;  %1585 = vmatprep.mubr.f32.mxu1 %v517_v3 }
 0x1d4   : > { %2099 = vmatprep.mubr.f32.mxu0 %v3226_v4 }
 0x1d6   : > { %1586 = vmatmul.mubr.f32.gmra.mrb[60].mxu1 %v4547_v27 }
 0x1d7   : > { %2100 = vmatmul.mubr.f32.gmra.mrb[60].mxu0 %v534_v47  ;;  %1591 = vmatprep.mubr.f32.mxu1 %v519_v40 }
 0x1d8   : > { %2105 = vmatprep.mubr.f32.mxu0 %v3226_v4 }
 0x1da   : > { %1592 = vmatmul.mubr.f32.gmra.mrb[62].mxu1 %v4548_v10 }
 0x1db   : > { %2106 = vmatmul.mubr.f32.gmra.mrb[62].mxu0 %v536_v55 }
 0x1f1   : > { %v1150_v36 = vpop.f32.mrb[0].mxu1 }
 0x1f2   : > { %v1152_v7 = vpop.f32.mrb[1].mxu1 }
 0x1f5   : > { %v1156_v62 = vpop.f32.mrb[2].mxu1 }
 0x1f6   : > { %v1158_v50 = vpop.f32.mrb[3].mxu1 }
 0x1f9   : > { %v1162_v61 = vpop.f32.mrb[4].mxu1 }
 0x1fa   : > { %v1164_v25 = vpop.f32.mrb[5].mxu1 }
 0x1fd   : > { %v1168_v30 = vpop.f32.mrb[6].mxu1 }
 0x1fe   : > { %v1170_v11 = vpop.f32.mrb[7].mxu1 }
 0x201   : > { %v1174_v51 = vpop.f32.mrb[8].mxu1 }
 0x202   : > { %v1176_v28 = vpop.f32.mrb[9].mxu1 }
 0x205   : > { %v4280_v41 = vpop.f32.mrb[10].mxu1 }
 0x206   : > { %v4282_v57 = vpop.f32.mrb[11].mxu1 }
 0x209   : > { %v4284_v17 = vpop.f32.mrb[12].mxu1 }
 0x20a   : > { %v4286_v33 = vpop.f32.mrb[13].mxu1 }
 0x20d   : > { %v4288_v4 = vpop.f32.mrb[14].mxu1 }
 0x20e   : > { %v4290_v12 = vpop.f32.mrb[15].mxu1 }
 0x211   : > { %v4292_v5 = vpop.f32.mrb[16].mxu1 }
 0x212   : > { %v4294_v20 = vpop.f32.mrb[17].mxu1 }
 0x215   : > { %v4296_v43 = vpop.f32.mrb[18].mxu1 }
 0x216   : > { %v4298_v58 = vpop.f32.mrb[19].mxu1 }
 0x219   : > { %v4300_v38 = vpop.f32.mrb[20].mxu1 }
 0x21a   : > { %v4302_v19 = vpop.f32.mrb[21].mxu1 }
 0x21d   : > { %v4304_v37 = vpop.f32.mrb[22].mxu1 }
 0x21e   : > { %v4306_v2 = vpop.f32.mrb[23].mxu1 }
 0x221   : > { %v4308_v53 = vpop.f32.mrb[24].mxu1 }
 0x222   : > { %v4310_v46 = vpop.f32.mrb[25].mxu1 }
 0x225   : > { %v4312_v52 = vpop.f32.mrb[26].mxu1 }
 0x226   : > { %v4314_v54 = vpop.f32.mrb[27].mxu1 }
 0x229   : > { %v4316_v44 = vpop.f32.mrb[28].mxu1 }
 0x22a   : > { %v4318_v29 = vpop.f32.mrb[29].mxu1 }
 0x22d   : > { %v4320_v42 = vpop.f32.mrb[30].mxu1 }
 0x22e   : > { %v4322_v23 = vpop.f32.mrb[31].mxu1 }
 0x232   : > { %v1921_v56 = vpop.f32.mrb[0].mxu0 }
 0x233   : > { %v2761_v13 = vadd.f32 %v1921_v56, %v1150_v36  ;;  %v1923_v49 = vpop.f32.mrb[1].mxu0 }
 0x234   : > { %v2762_v6 = vadd.f32 %v1923_v49, %v1152_v7 }
 0x235   : > { %v2186_v39 = vmul.f32 %v2761_v13, %v2761_v13 }
 0x236   : > { %v1927_v0 = vpop.f32.mrb[2].mxu0  ;;  %v2187_v21 = vmul.f32 %v2762_v6, %v2762_v6 }
 0x237   : > { %v2763_v22 = vadd.f32 %v1927_v0, %v1156_v62  ;;  %v1929_v32 = vpop.f32.mrb[3].mxu0 }
 0x238   : > { %v2764_v59 = vadd.f32 %v1929_v32, %v1158_v50 }
 0x239   : > { %v2112_v48 = vadd.f32 %v2763_v22, %v2761_v13  ;;  %v2188_v60 = vmul.f32 %v2763_v22, %v2763_v22 }
 0x23a   : > { %v2149_v45 = vadd.f32 %v2764_v59, %v2762_v6  ;;  %v2189_v26 = vmul.f32 %v2764_v59, %v2764_v59  ;;  %v1933_v24 = vpop.f32.mrb[4].mxu0 }
 0x23b   : > { %v2250_v63 = vadd.f32 %v2188_v60, %v2186_v39  ;;  %v2765_v18 = vadd.f32 %v1933_v24, %v1162_v61  ;;  %v1935_v9 = vpop.f32.mrb[5].mxu0 }
 0x23c   : > { %v2287_v8 = vadd.f32 %v2189_v26, %v2187_v21  ;;  %v2766_v15 = vadd.f32 %v1935_v9, %v1164_v25 }
 0x23d   : > { %v2113_v1 = vadd.f32 %v2765_v18, %v2112_v48  ;;  %v2190_v34 = vmul.f32 %v2765_v18, %v2765_v18 }
 0x23e   : > { %v2150_v3 = vadd.f32 %v2766_v15, %v2149_v45  ;;  %v2191_v16 = vmul.f32 %v2766_v15, %v2766_v15  ;;  %v1939_v40 = vpop.f32.mrb[6].mxu0 }
 0x23f   : > { %v2251_v31 = vadd.f32 %v2250_v63, %v2190_v34  ;;  %v2767_v14 = vadd.f32 %v1939_v40, %v1168_v30  ;;  %v1941_v47 = vpop.f32.mrb[7].mxu0 }
 0x240   : > { %v2288_v35 = vadd.f32 %v2287_v8, %v2191_v16  ;;  %v2768_v27 = vadd.f32 %v1941_v47, %v1170_v11 }
 0x241   : > { %v2114_v55 = vadd.f32 %v2767_v14, %v2113_v1  ;;  %v2192_v10 = vmul.f32 %v2767_v14, %v2767_v14 }
 0x242   : > { %v2151_v36 = vadd.f32 %v2768_v27, %v2150_v3  ;;  %v2193_v7 = vmul.f32 %v2768_v27, %v2768_v27  ;;  %v1945_v62 = vpop.f32.mrb[8].mxu0 }
 0x243   : > { %v2252_v50 = vadd.f32 %v2251_v31, %v2192_v10  ;;  %v2769_v61 = vadd.f32 %v1945_v62, %v1174_v51  ;;  %v1947_v56 = vpop.f32.mrb[9].mxu0 }
 0x244   : > { %v2289_v13 = vadd.f32 %v2288_v35, %v2193_v7  ;;  %v2770_v25 = vadd.f32 %v1947_v56, %v1176_v28 }
 0x245   : > { %v2115_v49 = vadd.f32 %v2769_v61, %v2114_v55  ;;  %v2194_v6 = vmul.f32 %v2769_v61, %v2769_v61 }
 0x246   : > { %v2152_v0 = vadd.f32 %v2770_v25, %v2151_v36  ;;  %v2195_v22 = vmul.f32 %v2770_v25, %v2770_v25  ;;  %v1951_v32 = vpop.f32.mrb[10].mxu0 }
 0x247   : > { %v2253_v59 = vadd.f32 %v2252_v50, %v2194_v6  ;;  %v2771_v30 = vadd.f32 %v1951_v32, %v4280_v41  ;;  %v1953_v39 = vpop.f32.mrb[11].mxu0 }
 0x248   : > { %v2290_v11 = vadd.f32 %v2289_v13, %v2195_v22  ;;  %v2772_v48 = vadd.f32 %v1953_v39, %v4282_v57 }
 0x249   : > { %v2116_v60 = vadd.f32 %v2771_v30, %v2115_v49  ;;  %v2196_v21 = vmul.f32 %v2771_v30, %v2771_v30 }
 0x24a   : > { %v2153_v45 = vadd.f32 %v2772_v48, %v2152_v0  ;;  %v2197_v26 = vmul.f32 %v2772_v48, %v2772_v48  ;;  %v1957_v51 = vpop.f32.mrb[12].mxu0 }
 0x24b   : > { %v2254_v24 = vadd.f32 %v2253_v59, %v2196_v21  ;;  %v2773_v28 = vadd.f32 %v1957_v51, %v4284_v17  ;;  %v1959_v63 = vpop.f32.mrb[13].mxu0 }
 0x24c   : > { %v2291_v18 = vadd.f32 %v2290_v11, %v2197_v26  ;;  %v2774_v9 = vadd.f32 %v1959_v63, %v4286_v33 }
 0x24d   : > { %v2117_v8 = vadd.f32 %v2773_v28, %v2116_v60  ;;  %v2198_v15 = vmul.f32 %v2773_v28, %v2773_v28 }
 0x24e   : > { %v2154_v1 = vadd.f32 %v2774_v9, %v2153_v45  ;;  %v2199_v41 = vmul.f32 %v2774_v9, %v2774_v9  ;;  %v1963_v34 = vpop.f32.mrb[14].mxu0 }
 0x24f   : > { %v2255_v3 = vadd.f32 %v2254_v24, %v2198_v15  ;;  %v2775_v57 = vadd.f32 %v1963_v34, %v4288_v4  ;;  %v1965_v16 = vpop.f32.mrb[15].mxu0 }
 0x250   : > { %v2292_v40 = vadd.f32 %v2291_v18, %v2199_v41  ;;  %v2776_v31 = vadd.f32 %v1965_v16, %v4290_v12 }
 0x251   : > { %v2118_v14 = vadd.f32 %v2775_v57, %v2117_v8  ;;  %v2200_v47 = vmul.f32 %v2775_v57, %v2775_v57 }
 0x252   : > { %v2155_v35 = vadd.f32 %v2776_v31, %v2154_v1  ;;  %v2201_v17 = vmul.f32 %v2776_v31, %v2776_v31  ;;  %v1969_v27 = vpop.f32.mrb[16].mxu0 }
 0x253   : > { %v2256_v55 = vadd.f32 %v2255_v3, %v2200_v47  ;;  %v2777_v33 = vadd.f32 %v1969_v27, %v4292_v5  ;;  %v1971_v10 = vpop.f32.mrb[17].mxu0 }
 0x254   : > { %v2293_v36 = vadd.f32 %v2292_v40, %v2201_v17  ;;  %v2778_v7 = vadd.f32 %v1971_v10, %v4294_v20 }
 0x255   : > { %v2119_v62 = vadd.f32 %v2777_v33, %v2118_v14  ;;  %v2202_v50 = vmul.f32 %v2777_v33, %v2777_v33 }
 0x256   : > { %v2156_v61 = vadd.f32 %v2778_v7, %v2155_v35  ;;  %v2203_v4 = vmul.f32 %v2778_v7, %v2778_v7  ;;  %v1975_v56 = vpop.f32.mrb[18].mxu0 }
 0x257   : > { %v2257_v13 = vadd.f32 %v2256_v55, %v2202_v50  ;;  %v2779_v12 = vadd.f32 %v1975_v56, %v4296_v43  ;;  %v1977_v25 = vpop.f32.mrb[19].mxu0 }
 0x258   : > { %v2294_v49 = vadd.f32 %v2293_v36, %v2203_v4  ;;  %v2780_v6 = vadd.f32 %v1977_v25, %v4298_v58 }
 0x259   : > { %v2120_v0 = vadd.f32 %v2779_v12, %v2119_v62  ;;  %v2204_v22 = vmul.f32 %v2779_v12, %v2779_v12 }
 0x25a   : > { %v2157_v32 = vadd.f32 %v2780_v6, %v2156_v61  ;;  %v2205_v5 = vmul.f32 %v2780_v6, %v2780_v6  ;;  %v1981_v59 = vpop.f32.mrb[20].mxu0 }
 0x25b   : > { %v2258_v30 = vadd.f32 %v2257_v13, %v2204_v22  ;;  %v2781_v20 = vadd.f32 %v1981_v59, %v4300_v38  ;;  %v1983_v39 = vpop.f32.mrb[21].mxu0 }
 0x25c   : > { %v2295_v11 = vadd.f32 %v2294_v49, %v2205_v5  ;;  %v2782_v48 = vadd.f32 %v1983_v39, %v4302_v19 }
 0x25d   : > { %v2121_v60 = vadd.f32 %v2781_v20, %v2120_v0  ;;  %v2206_v21 = vmul.f32 %v2781_v20, %v2781_v20 }
 0x25e   : > { %v2158_v45 = vadd.f32 %v2782_v48, %v2157_v32  ;;  %v2207_v43 = vmul.f32 %v2782_v48, %v2782_v48  ;;  %v1987_v26 = vpop.f32.mrb[22].mxu0 }
 0x25f   : > { %v2259_v51 = vadd.f32 %v2258_v30, %v2206_v21  ;;  %v2783_v58 = vadd.f32 %v1987_v26, %v4304_v37  ;;  %v1989_v24 = vpop.f32.mrb[23].mxu0 }
 0x260   : > { %v2296_v28 = vadd.f32 %v2295_v11, %v2207_v43  ;;  %v2784_v63 = vadd.f32 %v1989_v24, %v4306_v2 }
 0x261   : > { %v2122_v18 = vadd.f32 %v2783_v58, %v2121_v60  ;;  %v2208_v9 = vmul.f32 %v2783_v58, %v2783_v58 }
 0x262   : > { %v2159_v8 = vadd.f32 %v2784_v63, %v2158_v45  ;;  %v2209_v38 = vmul.f32 %v2784_v63, %v2784_v63  ;;  %v1993_v15 = vpop.f32.mrb[24].mxu0 }
 0x263   : > { %v2260_v1 = vadd.f32 %v2259_v51, %v2208_v9  ;;  %v2785_v19 = vadd.f32 %v1993_v15, %v4308_v53  ;;  %v1995_v41 = vpop.f32.mrb[25].mxu0 }
 0x264   : > { %v2297_v34 = vadd.f32 %v2296_v28, %v2209_v38  ;;  %v2786_v3 = vadd.f32 %v1995_v41, %v4310_v46 }
 0x265   : > { %v2123_v57 = vadd.f32 %v2785_v19, %v2122_v18  ;;  %v2210_v16 = vmul.f32 %v2785_v19, %v2785_v19 }
 0x266   : > { %v2160_v40 = vadd.f32 %v2786_v3, %v2159_v8  ;;  %v2211_v37 = vmul.f32 %v2786_v3, %v2786_v3  ;;  %v1999_v31 = vpop.f32.mrb[26].mxu0 }
 0x267   : > { %v2261_v14 = vadd.f32 %v2260_v1, %v2210_v16  ;;  %v2787_v2 = vadd.f32 %v1999_v31, %v4312_v52  ;;  %v2001_v47 = vpop.f32.mrb[27].mxu0 }
 0x268   : > { %v2298_v35 = vadd.f32 %v2297_v34, %v2211_v37  ;;  %v2788_v17 = vadd.f32 %v2001_v47, %v4314_v54 }
 0x269   : > { %v2124_v27 = vadd.f32 %v2787_v2, %v2123_v57  ;;  %v2212_v55 = vmul.f32 %v2787_v2, %v2787_v2 }
 0x26a   : > { %v2161_v33 = vadd.f32 %v2788_v17, %v2160_v40  ;;  %v2213_v53 = vmul.f32 %v2788_v17, %v2788_v17  ;;  %v2005_v10 = vpop.f32.mrb[28].mxu0 }
 0x26b   : > { %v2262_v36 = vadd.f32 %v2261_v14, %v2212_v55  ;;  %v2789_v46 = vadd.f32 %v2005_v10, %v4316_v44  ;;  %v2007_v7 = vpop.f32.mrb[29].mxu0 }
 0x26c   : > { %v2299_v62 = vadd.f32 %v2298_v35, %v2213_v53  ;;  %v2790_v50 = vadd.f32 %v2007_v7, %v4318_v29 }
 0x26d   : > { %v2125_v61 = vadd.f32 %v2789_v46, %v2124_v27  ;;  %v2214_v4 = vmul.f32 %v2789_v46, %v2789_v46 }
 0x26e   : > { %v2162_v56 = vadd.f32 %v2790_v50, %v2161_v33  ;;  %v2215_v52 = vmul.f32 %v2790_v50, %v2790_v50  ;;  %v2011_v13 = vpop.f32.mrb[30].mxu0 }
 0x26f   : > { %v2263_v12 = vadd.f32 %v2262_v36, %v2214_v4  ;;  %v2791_v54 = vadd.f32 %v2011_v13, %v4320_v42  ;;  %v2013_v25 = vpop.f32.mrb[31].mxu0 }
 0x270   : > { %v2300_v49 = vadd.f32 %v2299_v62, %v2215_v52  ;;  %v2792_v6 = vadd.f32 %v2013_v25, %v4322_v23 }
 0x271   : > { %v2126_v0 = vadd.f32 %v2791_v54, %v2125_v61  ;;  %v2216_v22 = vmul.f32 %v2791_v54, %v2791_v54  ;;  %v1503_v32 = vpop.f32.mrb[32].mxu1 }
 0x272   : > { %v2163_v44 = vadd.f32 %v2792_v6, %v2162_v56  ;;  %v2217_v5 = vmul.f32 %v2792_v6, %v2792_v6  ;;  %v2017_v59 = vpop.f32.mrb[32].mxu0  ;;  %v1505_v30 = vpop.f32.mrb[33].mxu1 }
 0x273   : > { %v2264_v29 = vadd.f32 %v2263_v12, %v2216_v22  ;;  %v2793_v20 = vadd.f32 %v2017_v59, %v1503_v32  ;;  %v2019_v39 = vpop.f32.mrb[33].mxu0 }
 0x274   : > { %v2301_v11 = vadd.f32 %v2300_v49, %v2217_v5  ;;  %v2794_v48 = vadd.f32 %v2019_v39, %v1505_v30 }
 0x275   : > { %v2127_v60 = vadd.f32 %v2793_v20, %v2126_v0  ;;  %v2218_v21 = vmul.f32 %v2793_v20, %v2793_v20  ;;  %v1509_v45 = vpop.f32.mrb[34].mxu1 }
 0x276   : > { %v2164_v42 = vadd.f32 %v2794_v48, %v2163_v44  ;;  %v2219_v43 = vmul.f32 %v2794_v48, %v2794_v48  ;;  %v2023_v26 = vpop.f32.mrb[34].mxu0  ;;  %v1511_v51 = vpop.f32.mrb[35].mxu1 }
 0x277   : > { %v2265_v23 = vadd.f32 %v2264_v29, %v2218_v21  ;;  %v2795_v58 = vadd.f32 %v2023_v26, %v1509_v45  ;;  %v2025_v24 = vpop.f32.mrb[35].mxu0 }
 0x278   : > { %v2302_v28 = vadd.f32 %v2301_v11, %v2219_v43  ;;  %v2796_v63 = vadd.f32 %v2025_v24, %v1511_v51 }
 0x279   : > { %v2128_v18 = vadd.f32 %v2795_v58, %v2127_v60  ;;  %v2220_v9 = vmul.f32 %v2795_v58, %v2795_v58  ;;  %v1515_v8 = vpop.f32.mrb[36].mxu1 }
 0x27a   : > { %v2165_v38 = vadd.f32 %v2796_v63, %v2164_v42  ;;  %v2221_v15 = vmul.f32 %v2796_v63, %v2796_v63  ;;  %v2029_v1 = vpop.f32.mrb[36].mxu0  ;;  %v1517_v19 = vpop.f32.mrb[37].mxu1 }
 0x27b   : > { %v2266_v41 = vadd.f32 %v2265_v23, %v2220_v9  ;;  %v2797_v34 = vadd.f32 %v2029_v1, %v1515_v8  ;;  %v2031_v3 = vpop.f32.mrb[37].mxu0 }
 0x27c   : > { %v2303_v57 = vadd.f32 %v2302_v28, %v2221_v15  ;;  %v2798_v16 = vadd.f32 %v2031_v3, %v1517_v19 }
 0x27d   : > { %v2129_v40 = vadd.f32 %v2797_v34, %v2128_v18  ;;  %v2222_v37 = vmul.f32 %v2797_v34, %v2797_v34  ;;  %v1521_v31 = vpop.f32.mrb[38].mxu1 }
 0x27e   : > { %v2166_v14 = vadd.f32 %v2798_v16, %v2165_v38  ;;  %v2223_v2 = vmul.f32 %v2798_v16, %v2798_v16  ;;  %v2035_v47 = vpop.f32.mrb[38].mxu0  ;;  %v1523_v35 = vpop.f32.mrb[39].mxu1 }
 0x27f   : > { %v2267_v17 = vadd.f32 %v2266_v41, %v2222_v37  ;;  %v2799_v27 = vadd.f32 %v2035_v47, %v1521_v31  ;;  %v2037_v55 = vpop.f32.mrb[39].mxu0 }
 0x280   : > { %v2304_v33 = vadd.f32 %v2303_v57, %v2223_v2  ;;  %v2800_v53 = vadd.f32 %v2037_v55, %v1523_v35 }
 0x281   : > { %v2130_v10 = vadd.f32 %v2799_v27, %v2129_v40  ;;  %v2224_v36 = vmul.f32 %v2799_v27, %v2799_v27  ;;  %v1527_v46 = vpop.f32.mrb[40].mxu1 }
 0x282   : > { %v2167_v7 = vadd.f32 %v2800_v53, %v2166_v14  ;;  %v2225_v62 = vmul.f32 %v2800_v53, %v2800_v53  ;;  %v2041_v50 = vpop.f32.mrb[40].mxu0  ;;  %v1529_v61 = vpop.f32.mrb[41].mxu1 }
 0x283   : > { %v2268_v4 = vadd.f32 %v2267_v17, %v2224_v36  ;;  %v2801_v56 = vadd.f32 %v2041_v50, %v1527_v46  ;;  %v2043_v52 = vpop.f32.mrb[41].mxu0 }
 0x284   : > { %v2305_v13 = vadd.f32 %v2304_v33, %v2225_v62  ;;  %v2802_v12 = vadd.f32 %v2043_v52, %v1529_v61 }
 0x285   : > { %v2131_v54 = vadd.f32 %v2801_v56, %v2130_v10  ;;  %v2226_v25 = vmul.f32 %v2801_v56, %v2801_v56  ;;  %v1533_v49 = vpop.f32.mrb[42].mxu1 }
 0x286   : > { %v2168_v6 = vadd.f32 %v2802_v12, %v2167_v7  ;;  %v2227_v0 = vmul.f32 %v2802_v12, %v2802_v12  ;;  %v2047_v22 = vpop.f32.mrb[42].mxu0  ;;  %v1535_v32 = vpop.f32.mrb[43].mxu1 }
 0x287   : > { %v2269_v44 = vadd.f32 %v2268_v4, %v2226_v25  ;;  %v2803_v5 = vadd.f32 %v2047_v22, %v1533_v49  ;;  %v2049_v59 = vpop.f32.mrb[43].mxu0 }
 0x288   : > { %v2306_v30 = vadd.f32 %v2305_v13, %v2227_v0  ;;  %v2804_v29 = vadd.f32 %v2049_v59, %v1535_v32 }
 0x289   : > { %v2132_v20 = vadd.f32 %v2803_v5, %v2131_v54  ;;  %v2228_v39 = vmul.f32 %v2803_v5, %v2803_v5  ;;  %v1539_v11 = vpop.f32.mrb[44].mxu1 }
 0x28a   : > { %v2169_v48 = vadd.f32 %v2804_v29, %v2168_v6  ;;  %v2229_v60 = vmul.f32 %v2804_v29, %v2804_v29  ;;  %v2053_v21 = vpop.f32.mrb[44].mxu0  ;;  %v1541_v45 = vpop.f32.mrb[45].mxu1 }
 0x28b   : > { %v2270_v42 = vadd.f32 %v2269_v44, %v2228_v39  ;;  %v2805_v43 = vadd.f32 %v2053_v21, %v1539_v11  ;;  %v2055_v26 = vpop.f32.mrb[45].mxu0 }
 0x28c   : > { %v2307_v51 = vadd.f32 %v2306_v30, %v2229_v60  ;;  %v2806_v23 = vadd.f32 %v2055_v26, %v1541_v45 }
 0x28d   : > { %v2133_v58 = vadd.f32 %v2805_v43, %v2132_v20  ;;  %v2230_v24 = vmul.f32 %v2805_v43, %v2805_v43  ;;  %v1545_v28 = vpop.f32.mrb[46].mxu1 }
 0x28e   : > { %v2170_v63 = vadd.f32 %v2806_v23, %v2169_v48  ;;  %v2231_v18 = vmul.f32 %v2806_v23, %v2806_v23  ;;  %v2059_v9 = vpop.f32.mrb[46].mxu0  ;;  %v1547_v8 = vpop.f32.mrb[47].mxu1 }
 0x28f   : > { %v2271_v38 = vadd.f32 %v2270_v42, %v2230_v24  ;;  %v2807_v15 = vadd.f32 %v2059_v9, %v1545_v28  ;;  %v2061_v1 = vpop.f32.mrb[47].mxu0 }
 0x290   : > { %v2308_v19 = vadd.f32 %v2307_v51, %v2231_v18  ;;  %v2808_v41 = vadd.f32 %v2061_v1, %v1547_v8 }
 0x291   : > { %v2134_v34 = vadd.f32 %v2807_v15, %v2133_v58  ;;  %v2232_v3 = vmul.f32 %v2807_v15, %v2807_v15  ;;  %v1551_v57 = vpop.f32.mrb[48].mxu1 }
 0x292   : > { %v2171_v16 = vadd.f32 %v2808_v41, %v2170_v63  ;;  %v2233_v40 = vmul.f32 %v2808_v41, %v2808_v41  ;;  %v2065_v37 = vpop.f32.mrb[48].mxu0  ;;  %v1553_v31 = vpop.f32.mrb[49].mxu1 }
 0x293   : > { %v2272_v14 = vadd.f32 %v2271_v38, %v2232_v3  ;;  %v2809_v2 = vadd.f32 %v2065_v37, %v1551_v57  ;;  %v2067_v47 = vpop.f32.mrb[49].mxu0 }
 0x294   : > { %v2309_v35 = vadd.f32 %v2308_v19, %v2233_v40  ;;  %v2810_v17 = vadd.f32 %v2067_v47, %v1553_v31 }
 0x295   : > { %v2135_v27 = vadd.f32 %v2809_v2, %v2134_v34  ;;  %v2234_v55 = vmul.f32 %v2809_v2, %v2809_v2  ;;  %v1557_v33 = vpop.f32.mrb[50].mxu1 }
 0x296   : > { %v2172_v53 = vadd.f32 %v2810_v17, %v2171_v16  ;;  %v2235_v10 = vmul.f32 %v2810_v17, %v2810_v17  ;;  %v2071_v36 = vpop.f32.mrb[50].mxu0  ;;  %v1559_v46 = vpop.f32.mrb[51].mxu1 }
 0x297   : > { %v2273_v7 = vadd.f32 %v2272_v14, %v2234_v55  ;;  %v2811_v62 = vadd.f32 %v2071_v36, %v1557_v33  ;;  %v2073_v50 = vpop.f32.mrb[51].mxu0 }
 0x298   : > { %v2310_v61 = vadd.f32 %v2309_v35, %v2235_v10  ;;  %v2812_v4 = vadd.f32 %v2073_v50, %v1559_v46 }
 0x299   : > { %v2136_v56 = vadd.f32 %v2811_v62, %v2135_v27  ;;  %v2236_v52 = vmul.f32 %v2811_v62, %v2811_v62  ;;  %v1563_v13 = vpop.f32.mrb[52].mxu1 }
 0x29a   : > { %v2173_v12 = vadd.f32 %v2812_v4, %v2172_v53  ;;  %v2237_v54 = vmul.f32 %v2812_v4, %v2812_v4  ;;  %v2077_v25 = vpop.f32.mrb[52].mxu0  ;;  %v1565_v49 = vpop.f32.mrb[53].mxu1 }
 0x29b   : > { %v2274_v6 = vadd.f32 %v2273_v7, %v2236_v52  ;;  %v2813_v0 = vadd.f32 %v2077_v25, %v1563_v13  ;;  %v2079_v22 = vpop.f32.mrb[53].mxu0 }
 0x29c   : > { %v2311_v32 = vadd.f32 %v2310_v61, %v2237_v54  ;;  %v2814_v44 = vadd.f32 %v2079_v22, %v1565_v49 }
 0x29d   : > { %v2137_v5 = vadd.f32 %v2813_v0, %v2136_v56  ;;  %v2238_v59 = vmul.f32 %v2813_v0, %v2813_v0  ;;  %v1569_v30 = vpop.f32.mrb[54].mxu1 }
 0x29e   : > { %v2174_v29 = vadd.f32 %v2814_v44, %v2173_v12  ;;  %v2239_v20 = vmul.f32 %v2814_v44, %v2814_v44  ;;  %v2083_v39 = vpop.f32.mrb[54].mxu0  ;;  %v1571_v11 = vpop.f32.mrb[55].mxu1 }
 0x29f   : > { %v2275_v48 = vadd.f32 %v2274_v6, %v2238_v59  ;;  %v2815_v60 = vadd.f32 %v2083_v39, %v1569_v30  ;;  %v2085_v21 = vpop.f32.mrb[55].mxu0 }
 0x2a0   : > { %v2312_v45 = vadd.f32 %v2311_v32, %v2239_v20  ;;  %v2816_v42 = vadd.f32 %v2085_v21, %v1571_v11 }
 0x2a1   : > { %v2138_v43 = vadd.f32 %v2815_v60, %v2137_v5  ;;  %v2240_v26 = vmul.f32 %v2815_v60, %v2815_v60  ;;  %v1575_v51 = vpop.f32.mrb[56].mxu1 }
 0x2a2   : > { %v2175_v23 = vadd.f32 %v2816_v42, %v2174_v29  ;;  %v2241_v58 = vmul.f32 %v2816_v42, %v2816_v42  ;;  %v2089_v24 = vpop.f32.mrb[56].mxu0  ;;  %v1577_v28 = vpop.f32.mrb[57].mxu1 }
 0x2a3   : > { %v2276_v63 = vadd.f32 %v2275_v48, %v2240_v26  ;;  %v2817_v18 = vadd.f32 %v2089_v24, %v1575_v51  ;;  %v2091_v9 = vpop.f32.mrb[57].mxu0 }
 0x2a4   : > { %v2313_v8 = vadd.f32 %v2312_v45, %v2241_v58  ;;  %v2818_v38 = vadd.f32 %v2091_v9, %v1577_v28 }
 0x2a5   : > { %v2139_v15 = vadd.f32 %v2817_v18, %v2138_v43  ;;  %v2242_v1 = vmul.f32 %v2817_v18, %v2817_v18  ;;  %v1581_v19 = vpop.f32.mrb[58].mxu1 }
 0x2a6   : > { %v2176_v41 = vadd.f32 %v2818_v38, %v2175_v23  ;;  %v2243_v34 = vmul.f32 %v2818_v38, %v2818_v38  ;;  %v2095_v3 = vpop.f32.mrb[58].mxu0  ;;  %v1583_v57 = vpop.f32.mrb[59].mxu1 }
 0x2a7   : > { %v2277_v16 = vadd.f32 %v2276_v63, %v2242_v1  ;;  %v2819_v40 = vadd.f32 %v2095_v3, %v1581_v19  ;;  %v2097_v37 = vpop.f32.mrb[59].mxu0 }
 0x2a8   : > { %v2314_v31 = vadd.f32 %v2313_v8, %v2243_v34  ;;  %v2820_v14 = vadd.f32 %v2097_v37, %v1583_v57 }
 0x2a9   : > { %v2140_v2 = vadd.f32 %v2819_v40, %v2139_v15  ;;  %v2244_v47 = vmul.f32 %v2819_v40, %v2819_v40  ;;  %v1587_v35 = vpop.f32.mrb[60].mxu1 }
 0x2aa   : > { %v2177_v17 = vadd.f32 %v2820_v14, %v2176_v41  ;;  %v2245_v27 = vmul.f32 %v2820_v14, %v2820_v14  ;;  %v2101_v55 = vpop.f32.mrb[60].mxu0  ;;  %v1589_v33 = vpop.f32.mrb[61].mxu1 }
 0x2ab   : > { %v2278_v53 = vadd.f32 %v2277_v16, %v2244_v47  ;;  %v2821_v10 = vadd.f32 %v2101_v55, %v1587_v35  ;;  %v2103_v36 = vpop.f32.mrb[61].mxu0 }
 0x2ac   : > { %v2315_v46 = vadd.f32 %v2314_v31, %v2245_v27  ;;  %v2822_v7 = vadd.f32 %v2103_v36, %v1589_v33 }
 0x2ad   : > { %v2141_v62 = vadd.f32 %v2821_v10, %v2140_v2  ;;  %v2246_v50 = vmul.f32 %v2821_v10, %v2821_v10  ;;  %v1593_v61 = vpop.f32.mrb[62].mxu1 }
 0x2ae   : > { %v2178_v4 = vadd.f32 %v2822_v7, %v2177_v17  ;;  %v2247_v56 = vmul.f32 %v2822_v7, %v2822_v7  ;;  %v2107_v52 = vpop.f32.mrb[62].mxu0  ;;  %v1595_v13 = vpop.f32.mrb[63].mxu1 }
 0x2af   : > { %v2279_v12 = vadd.f32 %v2278_v53, %v2246_v50  ;;  %v2823_v54 = vadd.f32 %v2107_v52, %v1593_v61  ;;  %v2109_v25 = vpop.f32.mrb[63].mxu0 }
 0x2b0   : > { %v2316_v49 = vadd.f32 %v2315_v46, %v2247_v56  ;;  %v2824_v6 = vadd.f32 %v2109_v25, %v1595_v13 }
 0x2b1   : > { %v2142_v0 = vadd.f32 %v2823_v54, %v2141_v62  ;;  %v2248_v22 = vmul.f32 %v2823_v54, %v2823_v54 }
 0x2b2   : > { %v2179_v32 = vadd.f32 %v2824_v6, %v2178_v4  ;;  %v2249_v44 = vmul.f32 %v2824_v6, %v2824_v6 }
 0x2b3   : > { %v2143_v5 = vrot.slane %v2142_v0, 4  ;;  %v2280_v59 = vadd.f32 %v2279_v12, %v2248_v22 }
 0x2b4   : > { %v2180_v30 = vrot.slane %v2179_v32, 4  ;;  %v2317_v29 = vadd.f32 %v2316_v49, %v2249_v44 }
 0x2b5   : > { %v2144_v20 = vadd.f32 %v2143_v5, %v2142_v0  ;;  %v2281_v39 = vrot.slane %v2280_v59, 4 }
 0x2b6   : > { %v2181_v11 = vadd.f32 %v2180_v30, %v2179_v32  ;;  %v2318_v48 = vrot.slane %v2317_v29, 4 }
 0x2b7   : > { %v2145_v60 = vrot.slane %v2144_v20, 2  ;;  %v2282_v21 = vadd.f32 %v2281_v39, %v2280_v59 }
 0x2b8   : > { %v2182_v45 = vrot.slane %v2181_v11, 2  ;;  %v2319_v42 = vadd.f32 %v2318_v48, %v2317_v29 }
 0x2b9   : > { %v2146_v43 = vadd.f32 %v2145_v60, %v2144_v20  ;;  %v2283_v26 = vrot.slane %v2282_v21, 2 }
 0x2ba   : > { %v2183_v51 = vadd.f32 %v2182_v45, %v2181_v11  ;;  %v2320_v23 = vrot.slane %v2319_v42, 2 }
 0x2bb   : > { %v2147_v58 = vrot.slane %v2146_v43, 1  ;;  %v2284_v24 = vadd.f32 %v2283_v26, %v2282_v21 }
 0x2bc   : > { %v2184_v28 = vrot.slane %v2183_v51, 1  ;;  %v2321_v63 = vadd.f32 %v2320_v23, %v2319_v42 }
 0x2bd   : > { %v2285_v18 = vrot.slane %v2284_v24, 1  ;;  %v2148_v8 = vadd.f32 %v2147_v58, %v2146_v43 }
 0x2be   : > { %v2322_v9 = vrot.slane %v2321_v63, 1  ;;  %v2185_v15 = vadd.f32 %v2184_v28, %v2183_v51 }
 0x2bf   : > { %v2286_v38 = vadd.f32 %v2285_v18, %v2284_v24 }
 0x2c0   : > { %v2323_v1 = vadd.f32 %v2322_v9, %v2321_v63 }
 0x2c1   : > { %v2325_v19 = vsel %vm2324_vm2, %v2148_v8, %v2286_v38 }
 0x2c2   : > { %v2326_v41 = vsel %vm2324_vm2, %v2185_v15, %v2323_v1  ;;  %v2328_v34 = vsel %vm2327_vm3, %v2325_v19, 0.0 }
 0x2c3   : > { %v2329_v3 = vsel %vm2327_vm3, %v2326_v41, 0.0  ;;  %2330 = vst [vmem:[%s176_s27] sm:$0xff] %v2328_v34 }
 0x2c4   : > { %2331 = vst [vmem:[%s176_s27 + $0x8] sm:$0xff] %v2329_v3 }
 0x2c5   : > { %3161 = shalt.err (!%p3158_p7)
}
 0x2c6   : > { %s3162_s24 = scalar_lea.hbm %s4351_s4, 256  ;;  %s3166_s26 = scalar_lea.hbm %s4397_s2, 512 }
 0x2c7   : > { %p3163_p9 = scmp.ne.s32.totalorder %s4351_s4, %s3162_s24  ;;  %p3167_p5 = scmp.lt.u32.totalorder %s4351_s4, %s4397_s2 }
 0x2c8   : > { %p3168_p11 = scmp.lt.u32.totalorder %s3166_s26, %s3162_s24  ;;  %p3170_p4 = scmp.lt.u32.totalorder %s3162_s24, %s4351_s4 }
 0x2c9   : > { %p3164_p2 = pnand %p3163_p9, %p3334_p12 }
 0x2ca   : > { %p3169_p1 = por %p3168_p11, %p3167_p5 }
 0x2cb   : > { %p3165_p0 = pneg %p3164_p2 }
 0x2cc   : > { %p3171_p6 = por %p3170_p4, %p3169_p1 }
 0x2ce   : > { %p3172_p8 = pnand %p3171_p6, %p3165_p0 }
 0x2d0   : > { %3175 = shalt.err (!%p3172_p8)
}
 0x2d1   : > { %3026 = dma.vmem_to_hbm [thread:$0]  (%p3334_p12), %s4353_s19, 256, %s4351_s4, %s2333_s13  }
 0x2d2 PF: > { %s2359_s30 = sand.u32 1, %s3206_s9   ;;  %p4549_p10 = scmp.ne.s32.totalorder %s4456_s16, 0 }
 0x2d3   : > { %p4550_p13 = scmp.ge.s32.totalorder %s3218_s12, 2  ;;  %s2360_s3 = scalar_lea.sflag [#allocation4], %s2359_s30 }
 0x2d5   : > { %p3037_p3 = pnand %p4550_p13, %p4549_p10 }
 0x2d7   : > { %3201 = dma.done.wait (!%p3037_p3), %s2360_s3, 256  }
 0x2d8   : > { %3203 = vsyncadd (!%p3037_p3), %s2360_s3, 4294967040  ;;  %p16_p7 = scmp.ge.s32.totalorder %s3299_s21, 4   ;;  %s4551_s9 = smov %s3210_s10 }
 0x2d9   : > { %s4552_s10 = smov %s3214_s11  ;;  %s4553_s11 = smov %s3330_s8 }
 0x2da   : > { %s4554_s12 = smov %s3299_s21  ;;  %18 = sbr.rel (!%p16_p7) target bundleno = 6 (0x6), region = 77 }
 0x2e1   :  { %2365 = vsyncpa [#allocation3], 1 }
 0x2e2   :  { %2367 = vsyncpa [#allocation3 + $0x1], 1 }
 0x2e3   :  { %2368 = vsyncpa [#allocation6], 1 }
 0x2e4   :  { %2369 = vsyncpa [#allocation4], 1 }
 0x2e5   :  { %2371 = vsyncpa [#allocation4 + $0x1], 1 }

</bundles_post_ra>
